<compile_context>
chip_gen: v6e
topology: v6e:2x2x1
jax: 0.10.0
libtpu: 0.0.40
codegen_flags: <defaults>
</compile_context>

<pallas_src>
import jax
import jax.numpy as jnp
from jax.experimental import pallas as pl
from jax.experimental.pallas import tpu as pltpu

SLOT = 128  # lane-aligned slot width inside the packed output slab


def decoder_hier_attn(x, h0, hidden_states, contextvector, params):
    B, T, I = x.shape
    H = h0.shape[1]
    N = hidden_states.shape[1]
    L = contextvector.shape[1]
    O = params["w_out"].shape[1]

    # ---- batch padded to a sublane multiple so every per-step slice is 8-aligned ----
    BP = ((B + 7) // 8) * 8
    pad = BP - B
    if pad:
        x = jnp.pad(x, ((0, pad), (0, 0), (0, 0)))
        h0 = jnp.pad(h0, ((0, pad), (0, 0)))
        hidden_states = jnp.pad(hidden_states, ((0, pad), (0, 0), (0, 0)))
        contextvector = jnp.pad(contextvector, ((0, pad), (0, 0), (0, 0)))

    # ---- weight fusion into ONE slab (layout plumbing; cached at model-build in practice) ----
    CW = 3 * H                                    # slab column width (widest fused weight)

    def padc(m):
        return jnp.pad(m, ((0, 0), (0, CW - m.shape[1])))

    wi_all = jnp.concatenate([params["w_ir"], params["w_iz"], params["w_in"]], axis=1)   # (I,3H)
    wh_all = jnp.concatenate([params["w_hr"], params["w_hz"], params["w_hn"]], axis=1)   # (H,3H)
    bi_all = jnp.concatenate([params["b_r"], params["b_z"], params["b_in"]], axis=1)     # (1,3H)
    wqa = jnp.concatenate([params["w_actx"], params["w_av_h"]], axis=1)                  # (H,2H)
    bqa = jnp.concatenate([params["b_actx"], params["b_av"]], axis=1)                    # (1,2H)

    # 8-aligned row offsets for the weight blocks (I and H are multiples of 8 here).
    R_WI, R_WH = 0, I
    R_WQA, R_WAVC = I + H, I + 2 * H
    R_WCG, R_WOUT = I + 3 * H, I + 4 * H
    R_BI = I + 5 * H
    R_BHN, R_BQA, R_BCG, R_BOUT = R_BI + 1, R_BI + 2, R_BI + 3, R_BI + 4

    w_slab = jnp.concatenate(
        [padc(wi_all), padc(wh_all), padc(wqa), padc(params["w_av_c"]),
         padc(params["w_cg2"]), padc(params["w_out"]),
         padc(bi_all), padc(params["b_hn"]), padc(bqa),
         padc(params["b_cg2"]), padc(params["b_out"])],
        axis=0)                                                                           # (I+5H+5, 3H)

    # ---- time-major flattened views: per-step access is an 8-aligned leading slice ----
    x_tm = jnp.transpose(x, (1, 0, 2)).reshape(T * BP, I)
    ctx_tm = jnp.transpose(contextvector, (1, 0, 2)).reshape(L * BP, H)

    slab_w = 6 * SLOT
    f32 = jnp.float32

    def kernel(x_ref, h0_ref, hs_ref, ctx_ref, w_ref, out_ref):
        def mm(a, b):
            return jnp.dot(a, b, preferred_element_type=f32)

        # ---- GRU: hoisted input projection (one matmul for all T steps) ----
        wi = w_ref[R_WI:R_WI + I, :]                              # (I, 3H)
        bi = w_ref[R_BI:R_BI + 1, :]                              # (1, 3H)
        gates_x = mm(x_ref[...], wi) + bi                         # (T*BP, 3H)

        Wh = w_ref[R_WH:R_WH + H, :]                              # (H, 3H), loaded once
        b_hn = w_ref[R_BHN:R_BHN + 1, 0:H]                        # (1, H)
        h = h0_ref[...]                                           # (BP, H)

        for t in range(T):                                        # static unroll, T small
            gx = gates_x[t * BP:(t + 1) * BP, :]                  # 8-aligned static slice
            gh = mm(h, Wh)                                        # one MXU op / step
            r = jax.nn.sigmoid(gx[:, 0:H] + gh[:, 0:H])
            z = jax.nn.sigmoid(gx[:, H:2 * H] + gh[:, H:2 * H])
            n = jnp.tanh(gx[:, 2 * H:3 * H] + r * (gh[:, 2 * H:3 * H] + b_hn))
            h = (1.0 - z) * n + z * h
        # h == hidden_t[-1]

        # ---- contextGen2 + MaxPool1d: one matmul, then running max over L ----
        wcg = w_ref[R_WCG:R_WCG + H, 0:H]
        bcg = w_ref[R_BCG:R_BCG + 1, 0:H]
        ctx2 = mm(ctx_ref[...], wcg) + bcg                        # (L*BP, H)
        ctx_pooled = ctx2[0:BP, :]
        for l in range(1, L):                                     # cheap VPU maxes
            ctx_pooled = jnp.maximum(ctx_pooled, ctx2[l * BP:(l + 1) * BP, :])

        # ---- attention: fused query / attn_vector(h) projection ----
        wq = w_ref[R_WQA:R_WQA + H, 0:2 * H]
        bq = w_ref[R_BQA:R_BQA + 1, 0:2 * H]
        qh = mm(h, wq) + bq                                       # (BP, 2H)
        query = qh[:, 0:H]                                        # attn_ctx(h)
        av_h = qh[:, H:2 * H]                                     # w_av_h @ h + b_av

        hs = hs_ref[...]                                          # (BP, N, H)
        scores = jnp.sum(hs * query[:, None, :], axis=-1)         # (BP, N)
        scores = scores - jnp.max(scores, axis=-1, keepdims=True)
        e = jnp.exp(scores)
        a = e / jnp.sum(e, axis=-1, keepdims=True)                # exact: a_t is exported

        c_t = jnp.sum(a[:, :, None] * hs, axis=1)                 # (BP, H)
        wavc = w_ref[R_WAVC:R_WAVC + H, 0:H]
        h_t = jnp.tanh(mm(c_t, wavc) + av_h)                      # tanh(attn_vector([c_t, h]))

        # hierattnmethod == 'mean': mean over concat of (ctx_pooled, h_t) along dim=1
        hier = 0.5 * (ctx_pooled + h_t)

        wout = w_ref[R_WOUT:R_WOUT + H, 0:O]
        bout = w_ref[R_BOUT:R_BOUT + 1, 0:O]
        output = mm(hier, wout) + bout                            # (BP, O)

        # ---- assemble packed slab in registers; one dense unmasked store ----
        def slot(v):
            w = v.shape[1]
            if w == SLOT:
                return v
            return jnp.concatenate([v, jnp.zeros((BP, SLOT - w), f32)], axis=1)

        out_ref[...] = jnp.concatenate(
            [slot(output), slot(ctx_pooled), slot(h), slot(h_t), slot(a), slot(hier)],
            axis=1)

    inputs = (x_tm, h0, hidden_states, ctx_tm, w_slab)

    def fs(shape):
        return pl.BlockSpec(shape, lambda i: (0,) * len(shape))

    # NOTE: grid=(1,) pins this to one TensorCore; for large batches on v7x add a
    # leading "parallel" batch grid axis to use the second core.
    slab = pl.pallas_call(
        kernel,
        out_shape=jax.ShapeDtypeStruct((BP, slab_w), f32),
        grid=(1,),
        in_specs=[fs(a.shape) for a in inputs],
        out_specs=fs((BP, slab_w)),
        compiler_params=pltpu.CompilerParams(
            dimension_semantics=("arbitrary",)),
    )(*inputs)

    output = slab[:B, 0:O]
    ctx_pooled = slab[:B, SLOT:SLOT + H]
    hidden_t = slab[:B, 2 * SLOT:2 * SLOT + H]
    h_t = slab[:B, 3 * SLOT:3 * SLOT + H]
    a_t = slab[:B, 4 * SLOT:4 * SLOT + N]
    hier_h_t = slab[:B, 5 * SLOT:5 * SLOT + H]
    return output, ctx_pooled, hidden_t, h_t, a_t, hier_h_t


def reference(x, h0, hidden_states, contextvector, params):
    """Pure-JAX mirror of the PyTorch forward (GRU branch, 'mean'), unfused weights."""
    B, T, _ = x.shape
    h = h0
    for t in range(T):
        x_t = x[:, t, :]
        r = jax.nn.sigmoid(x_t @ params["w_ir"] + h @ params["w_hr"] + params["b_r"])
        z = jax.nn.sigmoid(x_t @ params["w_iz"] + h @ params["w_hz"] + params["b_z"])
        n = jnp.tanh(x_t @ params["w_in"] + params["b_in"]
                     + r * (h @ params["w_hn"] + params["b_hn"]))
        h = (1.0 - z) * n + z * h

    ctx2 = jnp.einsum("blh,hk->blk", contextvector, params["w_cg2"]) + params["b_cg2"][None]
    ctx_pooled = jnp.max(ctx2, axis=1)

    query = h @ params["w_actx"] + params["b_actx"]
    scores = jnp.einsum("bnh,bh->bn", hidden_states, query)
    scores = scores - jnp.max(scores, axis=-1, keepdims=True)
    e = jnp.exp(scores)
    a = e / jnp.sum(e, axis=-1, keepdims=True)
    c_t = jnp.einsum("bn,bnh->bh", a, hidden_states)

    h_t = jnp.tanh(c_t @ params["w_av_c"] + h @ params["w_av_h"] + params["b_av"])
    hier = 0.5 * (ctx_pooled + h_t)
    output = hier @ params["w_out"] + params["b_out"]
    return output, ctx_pooled, h, h_t, a, hier


def make_params(key, I, H, O):
    ks = jax.random.split(key, 24)
    s = 0.1

    def rnd(k, shape):
        return (jax.random.normal(k, shape, jnp.float32) * s).astype(jnp.float32)

    return {
        # GRU (weights stored as (in, out) so kernel does x @ W)
        "w_ir": rnd(ks[0], (I, H)), "w_iz": rnd(ks[1], (I, H)), "w_in": rnd(ks[2], (I, H)),
        "w_hr": rnd(ks[3], (H, H)), "w_hz": rnd(ks[4], (H, H)), "w_hn": rnd(ks[5], (H, H)),
        "b_r": rnd(ks[6], (1, H)), "b_z": rnd(ks[7], (1, H)),
        "b_in": rnd(ks[8], (1, H)), "b_hn": rnd(ks[9], (1, H)),
        # attn_ctx : Linear(H, H)
        "w_actx": rnd(ks[10], (H, H)), "b_actx": rnd(ks[11], (1, H)),
        # attn_vector : Linear(2H, H), split into the c_t half and the hidden half
        # (preserves PyTorch's cat(c_t, h) column ordering of the 2H weight)
        "w_av_c": rnd(ks[12], (H, H)), "w_av_h": rnd(ks[13], (H, H)), "b_av": rnd(ks[14], (1, H)),
        # contextGen2 : Linear(H, H)
        "w_cg2": rnd(ks[15], (H, H)), "b_cg2": rnd(ks[16], (1, H)),
        # out : Linear(H, O)
        "w_out": rnd(ks[17], (H, O)), "b_out": rnd(ks[18], (1, O)),
    }


if __name__ == "__main__":
    # Small shapes consistent with the module.
    B = 4    # batch
    T = 6    # decoder_sequence_length (RNN unroll length of `input`)
    I = 8    # input_size
    H = 32   # hidden_size
    N = 8    # number of stored previous hidden states (attention memory)
    L = 10   # encoder_sequence_length (maxpool kernel size)
    O = 5    # output_size

    key = jax.random.PRNGKey(0)
    k_x, k_h, k_hs, k_ctx, k_p = jax.random.split(key, 5)

    x = jax.random.normal(k_x, (B, T, I), jnp.float32)
    h0 = jax.random.normal(k_h, (B, H), jnp.float32)
    hidden_states = jax.random.normal(k_hs, (B, N, H), jnp.float32)
    contextvector = jax.random.normal(k_ctx, (B, L, H), jnp.float32)
    params = make_params(k_p, I, H, O)

    outs = decoder_hier_attn(x, h0, hidden_states, contextvector, params)
    outs = jax.block_until_ready(outs)

    refs = reference(x, h0, hidden_states, contextvector, params)
    names = ["output", "ctx_pooled", "hidden_t", "h_t", "a_t", "hier_h_t"]
    for name, o, r in zip(names, outs, refs):
        assert o.shape == r.shape, (name, o.shape, r.shape)
        assert bool(jnp.all(jnp.isfinite(o))), name
        assert bool(jnp.allclose(o, r, rtol=2e-3, atol=2e-3)), name

    print("KERNEL_OK")
</pallas_src>

<mosaic_0001>
module attributes {stable_mosaic.version = 11 : i64} {
  func.func @kernel(%arg0: i32, %arg1: memref<48x8xf32, #tpu.memory_space<vmem>>, %arg2: memref<8x32xf32, #tpu.memory_space<vmem>>, %arg3: memref<8x8x32xf32, #tpu.memory_space<vmem>>, %arg4: memref<80x32xf32, #tpu.memory_space<vmem>>, %arg5: memref<173x96xf32, #tpu.memory_space<vmem>>, %arg6: memref<8x768xf32, #tpu.memory_space<vmem>>) attributes {dimension_semantics = [#tpu.dimension_semantics<arbitrary>], iteration_bounds = array<i64: 1>, scalar_prefetch = 0 : i64, scratch_operands = 0 : i64, tpu.core_type = #tpu.core_type<tc>, window_params = [{pipeline_mode = #tpu.pipeline_mode<synchronous>, transform_indices = @transform_0, window_bounds = array<i64: 48, 8>}, {pipeline_mode = #tpu.pipeline_mode<synchronous>, transform_indices = @transform_1, window_bounds = array<i64: 8, 32>}, {pipeline_mode = #tpu.pipeline_mode<synchronous>, transform_indices = @transform_2, window_bounds = array<i64: 8, 8, 32>}, {pipeline_mode = #tpu.pipeline_mode<synchronous>, transform_indices = @transform_3, window_bounds = array<i64: 80, 32>}, {pipeline_mode = #tpu.pipeline_mode<synchronous>, transform_indices = @transform_4, window_bounds = array<i64: 173, 96>}, {pipeline_mode = #tpu.pipeline_mode<synchronous>, transform_indices = @transform_5, window_bounds = array<i64: 8, 768>}]} {
    %c0 = arith.constant 0 : index
    %c0_0 = arith.constant 0 : index
    %0 = vector.load %arg5[%c0, %c0_0] : memref<173x96xf32, #tpu.memory_space<vmem>>, vector<8x96xf32>
    %c168 = arith.constant 168 : index
    %c0_1 = arith.constant 0 : index
    %1 = vector.load %arg5[%c168, %c0_1] : memref<173x96xf32, #tpu.memory_space<vmem>>, vector<1x96xf32>
    %c0_2 = arith.constant 0 : index
    %c0_3 = arith.constant 0 : index
    %2 = vector.load %arg1[%c0_2, %c0_3] : memref<48x8xf32, #tpu.memory_space<vmem>>, vector<48x8xf32>
    %cst = arith.constant dense<0.000000e+00> : vector<48x96xf32>
    %3 = tpu.matmul %2, %0, %cst {dimension_numbers = #tpu.dot_dimension_numbers<[1], [0], [0], [1], [0, 0, 1, 1], [], []>} : vector<48x8xf32>, vector<8x96xf32>, vector<48x96xf32> -> vector<48x96xf32>
    %4 = vector.broadcast %1 : vector<1x96xf32> to vector<48x96xf32>
    %5 = arith.addf %3, %4 : vector<48x96xf32>
    %c8 = arith.constant 8 : index
    %c0_4 = arith.constant 0 : index
    %6 = vector.load %arg5[%c8, %c0_4] : memref<173x96xf32, #tpu.memory_space<vmem>>, vector<32x96xf32>
    %c169 = arith.constant 169 : index
    %c0_5 = arith.constant 0 : index
    %7 = vector.load %arg5[%c169, %c0_5] : memref<173x96xf32, #tpu.memory_space<vmem>>, vector<1x32xf32>
    %c0_6 = arith.constant 0 : index
    %c0_7 = arith.constant 0 : index
    %8 = vector.load %arg2[%c0_6, %c0_7] : memref<8x32xf32, #tpu.memory_space<vmem>>, vector<8x32xf32>
    %9 = vector.extract_strided_slice %5 {offsets = [0, 0], sizes = [8, 96], strides = [1, 1]} : vector<48x96xf32> to vector<8x96xf32>
    %cst_8 = arith.constant dense<0.000000e+00> : vector<8x96xf32>
    %10 = tpu.matmul %8, %6, %cst_8 {dimension_numbers = #tpu.dot_dimension_numbers<[1], [0], [0], [1], [0, 0, 1, 1], [], []>} : vector<8x32xf32>, vector<32x96xf32>, vector<8x96xf32> -> vector<8x96xf32>
    %11 = vector.extract_strided_slice %9 {offsets = [0, 0], sizes = [8, 32], strides = [1, 1]} : vector<8x96xf32> to vector<8x32xf32>
    %12 = vector.extract_strided_slice %10 {offsets = [0, 0], sizes = [8, 32], strides = [1, 1]} : vector<8x96xf32> to vector<8x32xf32>
    %13 = arith.addf %11, %12 : vector<8x32xf32>
    %14 = arith.negf %13 : vector<8x32xf32>
    %15 = math.exp %14 : vector<8x32xf32>
    %cst_9 = arith.constant 1.000000e+00 : f32
    %16 = vector.broadcast %cst_9 : f32 to vector<8x32xf32>
    %17 = arith.addf %16, %15 : vector<8x32xf32>
    %18 = arith.divf %16, %17 : vector<8x32xf32>
    %19 = vector.extract_strided_slice %9 {offsets = [0, 32], sizes = [8, 32], strides = [1, 1]} : vector<8x96xf32> to vector<8x32xf32>
    %20 = vector.extract_strided_slice %10 {offsets = [0, 32], sizes = [8, 32], strides = [1, 1]} : vector<8x96xf32> to vector<8x32xf32>
    %21 = arith.addf %19, %20 : vector<8x32xf32>
    %22 = arith.negf %21 : vector<8x32xf32>
    %23 = math.exp %22 : vector<8x32xf32>
    %cst_10 = arith.constant 1.000000e+00 : f32
    %24 = vector.broadcast %cst_10 : f32 to vector<8x32xf32>
    %25 = arith.addf %24, %23 : vector<8x32xf32>
    %26 = arith.divf %24, %25 : vector<8x32xf32>
    %27 = vector.extract_strided_slice %9 {offsets = [0, 64], sizes = [8, 32], strides = [1, 1]} : vector<8x96xf32> to vector<8x32xf32>
    %28 = vector.extract_strided_slice %10 {offsets = [0, 64], sizes = [8, 32], strides = [1, 1]} : vector<8x96xf32> to vector<8x32xf32>
    %29 = vector.broadcast %7 : vector<1x32xf32> to vector<8x32xf32>
    %30 = arith.addf %28, %29 : vector<8x32xf32>
    %31 = arith.mulf %18, %30 : vector<8x32xf32>
    %32 = arith.addf %27, %31 : vector<8x32xf32>
    %33 = math.tanh %32 : vector<8x32xf32>
    %cst_11 = arith.constant 1.000000e+00 : f32
    %34 = vector.broadcast %cst_11 : f32 to vector<8x32xf32>
    %35 = arith.subf %34, %26 : vector<8x32xf32>
    %36 = arith.mulf %35, %33 : vector<8x32xf32>
    %37 = arith.mulf %26, %8 : vector<8x32xf32>
    %38 = arith.addf %36, %37 : vector<8x32xf32>
    %39 = vector.extract_strided_slice %5 {offsets = [8, 0], sizes = [8, 96], strides = [1, 1]} : vector<48x96xf32> to vector<8x96xf32>
    %cst_12 = arith.constant dense<0.000000e+00> : vector<8x96xf32>
    %40 = tpu.matmul %38, %6, %cst_12 {dimension_numbers = #tpu.dot_dimension_numbers<[1], [0], [0], [1], [0, 0, 1, 1], [], []>} : vector<8x32xf32>, vector<32x96xf32>, vector<8x96xf32> -> vector<8x96xf32>
    %41 = vector.extract_strided_slice %39 {offsets = [0, 0], sizes = [8, 32], strides = [1, 1]} : vector<8x96xf32> to vector<8x32xf32>
    %42 = vector.extract_strided_slice %40 {offsets = [0, 0], sizes = [8, 32], strides = [1, 1]} : vector<8x96xf32> to vector<8x32xf32>
    %43 = arith.addf %41, %42 : vector<8x32xf32>
    %44 = arith.negf %43 : vector<8x32xf32>
    %45 = math.exp %44 : vector<8x32xf32>
    %cst_13 = arith.constant 1.000000e+00 : f32
    %46 = vector.broadcast %cst_13 : f32 to vector<8x32xf32>
    %47 = arith.addf %46, %45 : vector<8x32xf32>
    %48 = arith.divf %46, %47 : vector<8x32xf32>
    %49 = vector.extract_strided_slice %39 {offsets = [0, 32], sizes = [8, 32], strides = [1, 1]} : vector<8x96xf32> to vector<8x32xf32>
    %50 = vector.extract_strided_slice %40 {offsets = [0, 32], sizes = [8, 32], strides = [1, 1]} : vector<8x96xf32> to vector<8x32xf32>
    %51 = arith.addf %49, %50 : vector<8x32xf32>
    %52 = arith.negf %51 : vector<8x32xf32>
    %53 = math.exp %52 : vector<8x32xf32>
    %cst_14 = arith.constant 1.000000e+00 : f32
    %54 = vector.broadcast %cst_14 : f32 to vector<8x32xf32>
    %55 = arith.addf %54, %53 : vector<8x32xf32>
    %56 = arith.divf %54, %55 : vector<8x32xf32>
    %57 = vector.extract_strided_slice %39 {offsets = [0, 64], sizes = [8, 32], strides = [1, 1]} : vector<8x96xf32> to vector<8x32xf32>
    %58 = vector.extract_strided_slice %40 {offsets = [0, 64], sizes = [8, 32], strides = [1, 1]} : vector<8x96xf32> to vector<8x32xf32>
    %59 = vector.broadcast %7 : vector<1x32xf32> to vector<8x32xf32>
    %60 = arith.addf %58, %59 : vector<8x32xf32>
    %61 = arith.mulf %48, %60 : vector<8x32xf32>
    %62 = arith.addf %57, %61 : vector<8x32xf32>
    %63 = math.tanh %62 : vector<8x32xf32>
    %cst_15 = arith.constant 1.000000e+00 : f32
    %64 = vector.broadcast %cst_15 : f32 to vector<8x32xf32>
    %65 = arith.subf %64, %56 : vector<8x32xf32>
    %66 = arith.mulf %65, %63 : vector<8x32xf32>
    %67 = arith.mulf %56, %38 : vector<8x32xf32>
    %68 = arith.addf %66, %67 : vector<8x32xf32>
    %69 = vector.extract_strided_slice %5 {offsets = [16, 0], sizes = [8, 96], strides = [1, 1]} : vector<48x96xf32> to vector<8x96xf32>
    %cst_16 = arith.constant dense<0.000000e+00> : vector<8x96xf32>
    %70 = tpu.matmul %68, %6, %cst_16 {dimension_numbers = #tpu.dot_dimension_numbers<[1], [0], [0], [1], [0, 0, 1, 1], [], []>} : vector<8x32xf32>, vector<32x96xf32>, vector<8x96xf32> -> vector<8x96xf32>
    %71 = vector.extract_strided_slice %69 {offsets = [0, 0], sizes = [8, 32], strides = [1, 1]} : vector<8x96xf32> to vector<8x32xf32>
    %72 = vector.extract_strided_slice %70 {offsets = [0, 0], sizes = [8, 32], strides = [1, 1]} : vector<8x96xf32> to vector<8x32xf32>
    %73 = arith.addf %71, %72 : vector<8x32xf32>
    %74 = arith.negf %73 : vector<8x32xf32>
    %75 = math.exp %74 : vector<8x32xf32>
    %cst_17 = arith.constant 1.000000e+00 : f32
    %76 = vector.broadcast %cst_17 : f32 to vector<8x32xf32>
    %77 = arith.addf %76, %75 : vector<8x32xf32>
    %78 = arith.divf %76, %77 : vector<8x32xf32>
    %79 = vector.extract_strided_slice %69 {offsets = [0, 32], sizes = [8, 32], strides = [1, 1]} : vector<8x96xf32> to vector<8x32xf32>
    %80 = vector.extract_strided_slice %70 {offsets = [0, 32], sizes = [8, 32], strides = [1, 1]} : vector<8x96xf32> to vector<8x32xf32>
    %81 = arith.addf %79, %80 : vector<8x32xf32>
    %82 = arith.negf %81 : vector<8x32xf32>
    %83 = math.exp %82 : vector<8x32xf32>
    %cst_18 = arith.constant 1.000000e+00 : f32
    %84 = vector.broadcast %cst_18 : f32 to vector<8x32xf32>
    %85 = arith.addf %84, %83 : vector<8x32xf32>
    %86 = arith.divf %84, %85 : vector<8x32xf32>
    %87 = vector.extract_strided_slice %69 {offsets = [0, 64], sizes = [8, 32], strides = [1, 1]} : vector<8x96xf32> to vector<8x32xf32>
    %88 = vector.extract_strided_slice %70 {offsets = [0, 64], sizes = [8, 32], strides = [1, 1]} : vector<8x96xf32> to vector<8x32xf32>
    %89 = vector.broadcast %7 : vector<1x32xf32> to vector<8x32xf32>
    %90 = arith.addf %88, %89 : vector<8x32xf32>
    %91 = arith.mulf %78, %90 : vector<8x32xf32>
    %92 = arith.addf %87, %91 : vector<8x32xf32>
    %93 = math.tanh %92 : vector<8x32xf32>
    %cst_19 = arith.constant 1.000000e+00 : f32
    %94 = vector.broadcast %cst_19 : f32 to vector<8x32xf32>
    %95 = arith.subf %94, %86 : vector<8x32xf32>
    %96 = arith.mulf %95, %93 : vector<8x32xf32>
    %97 = arith.mulf %86, %68 : vector<8x32xf32>
    %98 = arith.addf %96, %97 : vector<8x32xf32>
    %99 = vector.extract_strided_slice %5 {offsets = [24, 0], sizes = [8, 96], strides = [1, 1]} : vector<48x96xf32> to vector<8x96xf32>
    %cst_20 = arith.constant dense<0.000000e+00> : vector<8x96xf32>
    %100 = tpu.matmul %98, %6, %cst_20 {dimension_numbers = #tpu.dot_dimension_numbers<[1], [0], [0], [1], [0, 0, 1, 1], [], []>} : vector<8x32xf32>, vector<32x96xf32>, vector<8x96xf32> -> vector<8x96xf32>
    %101 = vector.extract_strided_slice %99 {offsets = [0, 0], sizes = [8, 32], strides = [1, 1]} : vector<8x96xf32> to vector<8x32xf32>
    %102 = vector.extract_strided_slice %100 {offsets = [0, 0], sizes = [8, 32], strides = [1, 1]} : vector<8x96xf32> to vector<8x32xf32>
    %103 = arith.addf %101, %102 : vector<8x32xf32>
    %104 = arith.negf %103 : vector<8x32xf32>
    %105 = math.exp %104 : vector<8x32xf32>
    %cst_21 = arith.constant 1.000000e+00 : f32
    %106 = vector.broadcast %cst_21 : f32 to vector<8x32xf32>
    %107 = arith.addf %106, %105 : vector<8x32xf32>
    %108 = arith.divf %106, %107 : vector<8x32xf32>
    %109 = vector.extract_strided_slice %99 {offsets = [0, 32], sizes = [8, 32], strides = [1, 1]} : vector<8x96xf32> to vector<8x32xf32>
    %110 = vector.extract_strided_slice %100 {offsets = [0, 32], sizes = [8, 32], strides = [1, 1]} : vector<8x96xf32> to vector<8x32xf32>
    %111 = arith.addf %109, %110 : vector<8x32xf32>
    %112 = arith.negf %111 : vector<8x32xf32>
    %113 = math.exp %112 : vector<8x32xf32>
    %cst_22 = arith.constant 1.000000e+00 : f32
    %114 = vector.broadcast %cst_22 : f32 to vector<8x32xf32>
    %115 = arith.addf %114, %113 : vector<8x32xf32>
    %116 = arith.divf %114, %115 : vector<8x32xf32>
    %117 = vector.extract_strided_slice %99 {offsets = [0, 64], sizes = [8, 32], strides = [1, 1]} : vector<8x96xf32> to vector<8x32xf32>
    %118 = vector.extract_strided_slice %100 {offsets = [0, 64], sizes = [8, 32], strides = [1, 1]} : vector<8x96xf32> to vector<8x32xf32>
    %119 = vector.broadcast %7 : vector<1x32xf32> to vector<8x32xf32>
    %120 = arith.addf %118, %119 : vector<8x32xf32>
    %121 = arith.mulf %108, %120 : vector<8x32xf32>
    %122 = arith.addf %117, %121 : vector<8x32xf32>
    %123 = math.tanh %122 : vector<8x32xf32>
    %cst_23 = arith.constant 1.000000e+00 : f32
    %124 = vector.broadcast %cst_23 : f32 to vector<8x32xf32>
    %125 = arith.subf %124, %116 : vector<8x32xf32>
    %126 = arith.mulf %125, %123 : vector<8x32xf32>
    %127 = arith.mulf %116, %98 : vector<8x32xf32>
    %128 = arith.addf %126, %127 : vector<8x32xf32>
    %129 = vector.extract_strided_slice %5 {offsets = [32, 0], sizes = [8, 96], strides = [1, 1]} : vector<48x96xf32> to vector<8x96xf32>
    %cst_24 = arith.constant dense<0.000000e+00> : vector<8x96xf32>
    %130 = tpu.matmul %128, %6, %cst_24 {dimension_numbers = #tpu.dot_dimension_numbers<[1], [0], [0], [1], [0, 0, 1, 1], [], []>} : vector<8x32xf32>, vector<32x96xf32>, vector<8x96xf32> -> vector<8x96xf32>
    %131 = vector.extract_strided_slice %129 {offsets = [0, 0], sizes = [8, 32], strides = [1, 1]} : vector<8x96xf32> to vector<8x32xf32>
    %132 = vector.extract_strided_slice %130 {offsets = [0, 0], sizes = [8, 32], strides = [1, 1]} : vector<8x96xf32> to vector<8x32xf32>
    %133 = arith.addf %131, %132 : vector<8x32xf32>
    %134 = arith.negf %133 : vector<8x32xf32>
    %135 = math.exp %134 : vector<8x32xf32>
    %cst_25 = arith.constant 1.000000e+00 : f32
    %136 = vector.broadcast %cst_25 : f32 to vector<8x32xf32>
    %137 = arith.addf %136, %135 : vector<8x32xf32>
    %138 = arith.divf %136, %137 : vector<8x32xf32>
    %139 = vector.extract_strided_slice %129 {offsets = [0, 32], sizes = [8, 32], strides = [1, 1]} : vector<8x96xf32> to vector<8x32xf32>
    %140 = vector.extract_strided_slice %130 {offsets = [0, 32], sizes = [8, 32], strides = [1, 1]} : vector<8x96xf32> to vector<8x32xf32>
    %141 = arith.addf %139, %140 : vector<8x32xf32>
    %142 = arith.negf %141 : vector<8x32xf32>
    %143 = math.exp %142 : vector<8x32xf32>
    %cst_26 = arith.constant 1.000000e+00 : f32
    %144 = vector.broadcast %cst_26 : f32 to vector<8x32xf32>
    %145 = arith.addf %144, %143 : vector<8x32xf32>
    %146 = arith.divf %144, %145 : vector<8x32xf32>
    %147 = vector.extract_strided_slice %129 {offsets = [0, 64], sizes = [8, 32], strides = [1, 1]} : vector<8x96xf32> to vector<8x32xf32>
    %148 = vector.extract_strided_slice %130 {offsets = [0, 64], sizes = [8, 32], strides = [1, 1]} : vector<8x96xf32> to vector<8x32xf32>
    %149 = vector.broadcast %7 : vector<1x32xf32> to vector<8x32xf32>
    %150 = arith.addf %148, %149 : vector<8x32xf32>
    %151 = arith.mulf %138, %150 : vector<8x32xf32>
    %152 = arith.addf %147, %151 : vector<8x32xf32>
    %153 = math.tanh %152 : vector<8x32xf32>
    %cst_27 = arith.constant 1.000000e+00 : f32
    %154 = vector.broadcast %cst_27 : f32 to vector<8x32xf32>
    %155 = arith.subf %154, %146 : vector<8x32xf32>
    %156 = arith.mulf %155, %153 : vector<8x32xf32>
    %157 = arith.mulf %146, %128 : vector<8x32xf32>
    %158 = arith.addf %156, %157 : vector<8x32xf32>
    %159 = vector.extract_strided_slice %5 {offsets = [40, 0], sizes = [8, 96], strides = [1, 1]} : vector<48x96xf32> to vector<8x96xf32>
    %cst_28 = arith.constant dense<0.000000e+00> : vector<8x96xf32>
    %160 = tpu.matmul %158, %6, %cst_28 {dimension_numbers = #tpu.dot_dimension_numbers<[1], [0], [0], [1], [0, 0, 1, 1], [], []>} : vector<8x32xf32>, vector<32x96xf32>, vector<8x96xf32> -> vector<8x96xf32>
    %161 = vector.extract_strided_slice %159 {offsets = [0, 0], sizes = [8, 32], strides = [1, 1]} : vector<8x96xf32> to vector<8x32xf32>
    %162 = vector.extract_strided_slice %160 {offsets = [0, 0], sizes = [8, 32], strides = [1, 1]} : vector<8x96xf32> to vector<8x32xf32>
    %163 = arith.addf %161, %162 : vector<8x32xf32>
    %164 = arith.negf %163 : vector<8x32xf32>
    %165 = math.exp %164 : vector<8x32xf32>
    %cst_29 = arith.constant 1.000000e+00 : f32
    %166 = vector.broadcast %cst_29 : f32 to vector<8x32xf32>
    %167 = arith.addf %166, %165 : vector<8x32xf32>
    %168 = arith.divf %166, %167 : vector<8x32xf32>
    %169 = vector.extract_strided_slice %159 {offsets = [0, 32], sizes = [8, 32], strides = [1, 1]} : vector<8x96xf32> to vector<8x32xf32>
    %170 = vector.extract_strided_slice %160 {offsets = [0, 32], sizes = [8, 32], strides = [1, 1]} : vector<8x96xf32> to vector<8x32xf32>
    %171 = arith.addf %169, %170 : vector<8x32xf32>
    %172 = arith.negf %171 : vector<8x32xf32>
    %173 = math.exp %172 : vector<8x32xf32>
    %cst_30 = arith.constant 1.000000e+00 : f32
    %174 = vector.broadcast %cst_30 : f32 to vector<8x32xf32>
    %175 = arith.addf %174, %173 : vector<8x32xf32>
    %176 = arith.divf %174, %175 : vector<8x32xf32>
    %177 = vector.extract_strided_slice %159 {offsets = [0, 64], sizes = [8, 32], strides = [1, 1]} : vector<8x96xf32> to vector<8x32xf32>
    %178 = vector.extract_strided_slice %160 {offsets = [0, 64], sizes = [8, 32], strides = [1, 1]} : vector<8x96xf32> to vector<8x32xf32>
    %179 = vector.broadcast %7 : vector<1x32xf32> to vector<8x32xf32>
    %180 = arith.addf %178, %179 : vector<8x32xf32>
    %181 = arith.mulf %168, %180 : vector<8x32xf32>
    %182 = arith.addf %177, %181 : vector<8x32xf32>
    %183 = math.tanh %182 : vector<8x32xf32>
    %cst_31 = arith.constant 1.000000e+00 : f32
    %184 = vector.broadcast %cst_31 : f32 to vector<8x32xf32>
    %185 = arith.subf %184, %176 : vector<8x32xf32>
    %186 = arith.mulf %185, %183 : vector<8x32xf32>
    %187 = arith.mulf %176, %158 : vector<8x32xf32>
    %188 = arith.addf %186, %187 : vector<8x32xf32>
    %c104 = arith.constant 104 : index
    %c0_32 = arith.constant 0 : index
    %189 = vector.load %arg5[%c104, %c0_32] : memref<173x96xf32, #tpu.memory_space<vmem>>, vector<32x32xf32>
    %c171 = arith.constant 171 : index
    %c0_33 = arith.constant 0 : index
    %190 = vector.load %arg5[%c171, %c0_33] : memref<173x96xf32, #tpu.memory_space<vmem>>, vector<1x32xf32>
    %c0_34 = arith.constant 0 : index
    %c0_35 = arith.constant 0 : index
    %191 = vector.load %arg4[%c0_34, %c0_35] : memref<80x32xf32, #tpu.memory_space<vmem>>, vector<80x32xf32>
    %cst_36 = arith.constant dense<0.000000e+00> : vector<80x32xf32>
    %192 = tpu.matmul %191, %189, %cst_36 {dimension_numbers = #tpu.dot_dimension_numbers<[1], [0], [0], [1], [0, 0, 1, 1], [], []>} : vector<80x32xf32>, vector<32x32xf32>, vector<80x32xf32> -> vector<80x32xf32>
    %193 = vector.broadcast %190 : vector<1x32xf32> to vector<80x32xf32>
    %194 = arith.addf %192, %193 : vector<80x32xf32>
    %195 = vector.extract_strided_slice %194 {offsets = [0, 0], sizes = [8, 32], strides = [1, 1]} : vector<80x32xf32> to vector<8x32xf32>
    %196 = vector.extract_strided_slice %194 {offsets = [8, 0], sizes = [8, 32], strides = [1, 1]} : vector<80x32xf32> to vector<8x32xf32>
    %197 = arith.maximumf %195, %196 : vector<8x32xf32>
    %198 = vector.extract_strided_slice %194 {offsets = [16, 0], sizes = [8, 32], strides = [1, 1]} : vector<80x32xf32> to vector<8x32xf32>
    %199 = arith.maximumf %197, %198 : vector<8x32xf32>
    %200 = vector.extract_strided_slice %194 {offsets = [24, 0], sizes = [8, 32], strides = [1, 1]} : vector<80x32xf32> to vector<8x32xf32>
    %201 = arith.maximumf %199, %200 : vector<8x32xf32>
    %202 = vector.extract_strided_slice %194 {offsets = [32, 0], sizes = [8, 32], strides = [1, 1]} : vector<80x32xf32> to vector<8x32xf32>
    %203 = arith.maximumf %201, %202 : vector<8x32xf32>
    %204 = vector.extract_strided_slice %194 {offsets = [40, 0], sizes = [8, 32], strides = [1, 1]} : vector<80x32xf32> to vector<8x32xf32>
    %205 = arith.maximumf %203, %204 : vector<8x32xf32>
    %206 = vector.extract_strided_slice %194 {offsets = [48, 0], sizes = [8, 32], strides = [1, 1]} : vector<80x32xf32> to vector<8x32xf32>
    %207 = arith.maximumf %205, %206 : vector<8x32xf32>
    %208 = vector.extract_strided_slice %194 {offsets = [56, 0], sizes = [8, 32], strides = [1, 1]} : vector<80x32xf32> to vector<8x32xf32>
    %209 = arith.maximumf %207, %208 : vector<8x32xf32>
    %210 = vector.extract_strided_slice %194 {offsets = [64, 0], sizes = [8, 32], strides = [1, 1]} : vector<80x32xf32> to vector<8x32xf32>
    %211 = arith.maximumf %209, %210 : vector<8x32xf32>
    %212 = vector.extract_strided_slice %194 {offsets = [72, 0], sizes = [8, 32], strides = [1, 1]} : vector<80x32xf32> to vector<8x32xf32>
    %213 = arith.maximumf %211, %212 : vector<8x32xf32>
    %c40 = arith.constant 40 : index
    %c0_37 = arith.constant 0 : index
    %214 = vector.load %arg5[%c40, %c0_37] : memref<173x96xf32, #tpu.memory_space<vmem>>, vector<32x64xf32>
    %c170 = arith.constant 170 : index
    %c0_38 = arith.constant 0 : index
    %215 = vector.load %arg5[%c170, %c0_38] : memref<173x96xf32, #tpu.memory_space<vmem>>, vector<1x64xf32>
    %cst_39 = arith.constant dense<0.000000e+00> : vector<8x64xf32>
    %216 = tpu.matmul %188, %214, %cst_39 {dimension_numbers = #tpu.dot_dimension_numbers<[1], [0], [0], [1], [0, 0, 1, 1], [], []>} : vector<8x32xf32>, vector<32x64xf32>, vector<8x64xf32> -> vector<8x64xf32>
    %217 = vector.broadcast %215 : vector<1x64xf32> to vector<8x64xf32>
    %218 = arith.addf %216, %217 : vector<8x64xf32>
    %219 = vector.extract_strided_slice %218 {offsets = [0, 0], sizes = [8, 32], strides = [1, 1]} : vector<8x64xf32> to vector<8x32xf32>
    %220 = vector.extract_strided_slice %218 {offsets = [0, 32], sizes = [8, 32], strides = [1, 1]} : vector<8x64xf32> to vector<8x32xf32>
    %c0_40 = arith.constant 0 : index
    %c0_41 = arith.constant 0 : index
    %c0_42 = arith.constant 0 : index
    %221 = vector.load %arg3[%c0_40, %c0_41, %c0_42] : memref<8x8x32xf32, #tpu.memory_space<vmem>>, vector<8x8x32xf32>
    %222 = vector.shape_cast %219 : vector<8x32xf32> to vector<8x1x32xf32>
    %223 = vector.broadcast %222 : vector<8x1x32xf32> to vector<8x8x32xf32>
    %224 = arith.mulf %221, %223 : vector<8x8x32xf32>
    %cst_43 = arith.constant dense<0.000000e+00> : vector<8x8xf32>
    %225 = vector.multi_reduction <add>, %224, %cst_43 [2] : vector<8x8x32xf32> to vector<8x8xf32>
    %cst_44 = arith.constant dense<0xFF800000> : vector<8xf32>
    %226 = vector.multi_reduction <maximumf>, %225, %cst_44 [1] : vector<8x8xf32> to vector<8xf32>
    %227 = vector.shape_cast %226 : vector<8xf32> to vector<8x1xf32>
    %228 = vector.broadcast %227 : vector<8x1xf32> to vector<8x8xf32>
    %229 = arith.subf %225, %228 : vector<8x8xf32>
    %230 = math.exp %229 : vector<8x8xf32>
    %cst_45 = arith.constant dense<0.000000e+00> : vector<8xf32>
    %231 = vector.multi_reduction <add>, %230, %cst_45 [1] : vector<8x8xf32> to vector<8xf32>
    %232 = vector.shape_cast %231 : vector<8xf32> to vector<8x1xf32>
    %233 = vector.broadcast %232 : vector<8x1xf32> to vector<8x8xf32>
    %234 = arith.divf %230, %233 : vector<8x8xf32>
    %235 = vector.shape_cast %234 : vector<8x8xf32> to vector<8x8x1xf32>
    %236 = vector.broadcast %235 : vector<8x8x1xf32> to vector<8x8x32xf32>
    %237 = arith.mulf %236, %221 : vector<8x8x32xf32>
    %cst_46 = arith.constant dense<0.000000e+00> : vector<8x32xf32>
    %238 = vector.multi_reduction <add>, %237, %cst_46 [1] : vector<8x8x32xf32> to vector<8x32xf32>
    %c72 = arith.constant 72 : index
    %c0_47 = arith.constant 0 : index
    %239 = vector.load %arg5[%c72, %c0_47] : memref<173x96xf32, #tpu.memory_space<vmem>>, vector<32x32xf32>
    %cst_48 = arith.constant dense<0.000000e+00> : vector<8x32xf32>
    %240 = tpu.matmul %238, %239, %cst_48 {dimension_numbers = #tpu.dot_dimension_numbers<[1], [0], [0], [1], [0, 0, 1, 1], [], []>} : vector<8x32xf32>, vector<32x32xf32>, vector<8x32xf32> -> vector<8x32xf32>
    %241 = arith.addf %240, %220 : vector<8x32xf32>
    %242 = math.tanh %241 : vector<8x32xf32>
    %243 = arith.addf %213, %242 : vector<8x32xf32>
    %cst_49 = arith.constant 5.000000e-01 : f32
    %244 = vector.broadcast %cst_49 : f32 to vector<8x32xf32>
    %245 = arith.mulf %244, %243 : vector<8x32xf32>
    %c136 = arith.constant 136 : index
    %c0_50 = arith.constant 0 : index
    %246 = vector.load %arg5[%c136, %c0_50] : memref<173x96xf32, #tpu.memory_space<vmem>>, vector<32x5xf32>
    %c172 = arith.constant 172 : index
    %c0_51 = arith.constant 0 : index
    %247 = vector.load %arg5[%c172, %c0_51] : memref<173x96xf32, #tpu.memory_space<vmem>>, vector<1x5xf32>
    %cst_52 = arith.constant dense<0.000000e+00> : vector<8x5xf32>
    %248 = tpu.matmul %245, %246, %cst_52 {dimension_numbers = #tpu.dot_dimension_numbers<[1], [0], [0], [1], [0, 0, 1, 1], [], []>} : vector<8x32xf32>, vector<32x5xf32>, vector<8x5xf32> -> vector<8x5xf32>
    %249 = vector.broadcast %247 : vector<1x5xf32> to vector<8x5xf32>
    %250 = arith.addf %248, %249 : vector<8x5xf32>
    %cst_53 = arith.constant 0.000000e+00 : f32
    %251 = vector.broadcast %cst_53 : f32 to vector<8x123xf32>
    %252 = tpu.concatenate %250, %251 in 1 : vector<8x5xf32>, vector<8x123xf32> -> vector<8x128xf32>
    %cst_54 = arith.constant 0.000000e+00 : f32
    %253 = vector.broadcast %cst_54 : f32 to vector<8x96xf32>
    %254 = tpu.concatenate %213, %253 in 1 : vector<8x32xf32>, vector<8x96xf32> -> vector<8x128xf32>
    %cst_55 = arith.constant 0.000000e+00 : f32
    %255 = vector.broadcast %cst_55 : f32 to vector<8x96xf32>
    %256 = tpu.concatenate %188, %255 in 1 : vector<8x32xf32>, vector<8x96xf32> -> vector<8x128xf32>
    %cst_56 = arith.constant 0.000000e+00 : f32
    %257 = vector.broadcast %cst_56 : f32 to vector<8x96xf32>
    %258 = tpu.concatenate %242, %257 in 1 : vector<8x32xf32>, vector<8x96xf32> -> vector<8x128xf32>
    %cst_57 = arith.constant 0.000000e+00 : f32
    %259 = vector.broadcast %cst_57 : f32 to vector<8x120xf32>
    %260 = tpu.concatenate %234, %259 in 1 : vector<8x8xf32>, vector<8x120xf32> -> vector<8x128xf32>
    %cst_58 = arith.constant 0.000000e+00 : f32
    %261 = vector.broadcast %cst_58 : f32 to vector<8x96xf32>
    %262 = tpu.concatenate %245, %261 in 1 : vector<8x32xf32>, vector<8x96xf32> -> vector<8x128xf32>
    %263 = tpu.concatenate %252, %254, %256, %258, %260, %262 in 1 : vector<8x128xf32>, vector<8x128xf32>, vector<8x128xf32>, vector<8x128xf32>, vector<8x128xf32>, vector<8x128xf32> -> vector<8x768xf32>
    %c0_59 = arith.constant 0 : index
    %c0_60 = arith.constant 0 : index
    %264 = vector.load %arg6[%c0_59, %c0_60] : memref<8x768xf32, #tpu.memory_space<vmem>>, vector<8x768xf32>
    tpu.vector_store %arg6[%c0_59, %c0_60], %263 {strides = array<i32>} : memref<8x768xf32, #tpu.memory_space<vmem>>, vector<8x768xf32>,
    return
  }
  func.func @transform_0(%arg0: i32) -> (i32, i32) {
    %c0_i32 = arith.constant 0 : i32
    %c0_i32_0 = arith.constant 0 : i32
    %c0_i32_1 = arith.constant 0 : i32
    return %c0_i32, %c0_i32_0 : i32, i32
  }
  func.func @transform_1(%arg0: i32) -> (i32, i32) {
    %c0_i32 = arith.constant 0 : i32
    %c0_i32_0 = arith.constant 0 : i32
    %c0_i32_1 = arith.constant 0 : i32
    return %c0_i32, %c0_i32_0 : i32, i32
  }
  func.func @transform_2(%arg0: i32) -> (i32, i32, i32) {
    %c0_i32 = arith.constant 0 : i32
    %c0_i32_0 = arith.constant 0 : i32
    %c0_i32_1 = arith.constant 0 : i32
    %c0_i32_2 = arith.constant 0 : i32
    return %c0_i32, %c0_i32_0, %c0_i32_1 : i32, i32, i32
  }
  func.func @transform_3(%arg0: i32) -> (i32, i32) {
    %c0_i32 = arith.constant 0 : i32
    %c0_i32_0 = arith.constant 0 : i32
    %c0_i32_1 = arith.constant 0 : i32
    return %c0_i32, %c0_i32_0 : i32, i32
  }
  func.func @transform_4(%arg0: i32) -> (i32, i32) {
    %c0_i32 = arith.constant 0 : i32
    %c0_i32_0 = arith.constant 0 : i32
    %c0_i32_1 = arith.constant 0 : i32
    return %c0_i32, %c0_i32_0 : i32, i32
  }
  func.func @transform_5(%arg0: i32) -> (i32, i32) {
    %c0_i32 = arith.constant 0 : i32
    %c0_i32_0 = arith.constant 0 : i32
    %c0_i32_1 = arith.constant 0 : i32
    return %c0_i32, %c0_i32_0 : i32, i32
  }
}

</mosaic_0001>

<bundles_post_ra>
// kernel: tpu_custom_call.1
= control target key start
LH: loop header
LB: loop body
LE: loop exit
PB: predicated region body
PF: predicated region fallthrough
CT: control target
= control target key end

     0   :  { %10 = vsyncpa [#allocation3], 0  ;;  %s2630_s0 = inlined_call_operand.vmem [shape: f32[48,8], index: 0, kind: input, shape index: {}]   ;;  %s2631_s1 = inlined_call_operand.vmem [shape: f32[8,32], index: 1, kind: input, shape index: {}]   ;;  %s2632_s2 = inlined_call_operand.vmem [shape: f32[8,8,32], index: 2, kind: input, shape index: {}]   ;;  %s2633_s3 = inlined_call_operand.vmem [shape: f32[80,32], index: 3, kind: input, shape index: {}]   ;;  %s2634_s4 = inlined_call_operand.hbm [shape: f32[173,96], index: 4, kind: input, shape index: {}]   ;;  %s2635_s5 = inlined_call_operand.hbm [shape: f32[8,768], index: 5, kind: output, shape index: {}]  }
   0x1   :  { %11 = vsyncpa [#allocation4], 0  ;;  %s2147_s18 = smov [#allocation2]  }
   0x2   :  { %s25_s19 = sshll.u32 %s2147_s18, 4  ;;  %s26_s19 = int_to_ptr.vmem [resolvable:$true] %s25_s19 }
   0x3   :  { %s2111_s20 = scalar_lea.vmem %s26_s19, 2816  ;;  %p2116_p1 = scmp.lt.s32.totalorder %s26_s19, %s26_s19 }
   0x4   :  { %p2112_p0 = scmp.ne.s32.totalorder %s26_s19, %s2111_s20  ;;  %p2117_p2 = scmp.lt.s32.totalorder %s2111_s20, %s2111_s20 }
   0x6   :  { %p2118_p3 = por %p2117_p2, %p2116_p1 }
   0x8   :  { %p2119_p4 = pnand %p2118_p3, %p2112_p0 }
   0xa   :  { %2122 = shalt.err (!%p2119_p4)
}
   0xb   :  { %s2148_s21 = smov 128   ;;  %s2149_s22 = smov 8  }
   0xc   :  { %31 = dma.hbm_to_vmem [thread:$0]  %s2634_s4, 2816, %s26_s19, [#allocation3], %s2148_s21, %s2148_s21, %s2149_s22  }
   0xd   :  { %2143 = dma.done.wait [#allocation3], 2816  }
   0xe   :  { %2144 = vsyncadd [#allocation3], 4294964480  ;;  %v2150_v0 = vmov 0.0   ;;  %vm2151_vm0 = vmmov 0   ;;  %v2194_v1 = vld [vmem:[#allocation2 + $0x20] sm:$0xff]  ;;  %vm47_vm1 = vcmask 64512  }
   0xf   :  { %1898 = vmatprep.subr.mxu1 %v2150_v0  ;;  %1906 = vmatprep.mubr.msk.f32.mxu1 %vm2151_vm0, %v2150_v0  ;;  %v35_v2 = vld [vmem:[#allocation2] sm:$0xff]  ;;  %v2200_v4 = vld [vmem:[#allocation2 + $0x18] sm:$0xff]  ;;  %v38_v5 = vld [vmem:[%s2630_s0 + $0x8] sm:$0xff]  ;;  %vm167_vm2 = vcmask 261120   ;;  %s2152_s30 = smov 64   ;;  %s2154_s14 = smov 96  }
  0x10   :  { %v37_v3 = vld [vmem:[%s2630_s0] sm:$0xff]  ;;  %1899 = vmatpush3.msra.mxu1 %v2194_v1  ;;  %1887 = vmatprep.subr.mxu0 %v35_v2  ;;  %v2206_v6 = vld [vmem:[#allocation2 + $0x10] sm:$0xff]  ;;  %v1794_v7 = vld [vmem:[#allocation2 + $0xa9] ss:$0 sm:$0xff]  ;;  %vm1218_vm3 = vcmask 1041409   ;;  %vm1220_vm4 = vcmask 1042434  }
  0x11   :  { %1900 = vmatprep.subr.mxu1 %v2150_v0  ;;  %1888 = vmatpush3.msra.mxu0 %v35_v2  ;;  %v2212_v8 = vld [vmem:[#allocation2 + $0x8] sm:$0xff]  ;;  %v166_v9 = vld [vmem:[%s2631_s1] sm:$0xff]  ;;  %s2153_s1 = smov 32   ;;  %v39_v27 = vld [vmem:[%s2630_s0 + $0x10] sm:$0xff]  ;;  %vm1222_vm5 = vcmask 1043459   ;;  %vm1224_vm6 = vcmask 1044484  }
  0x12   :  { %1889 = vmatprep.mubr.msk.f32.mxu0 %vm47_vm1, %v37_v3  ;;  %1901 = vmatpush3.msra.mxu1 %v2200_v4  ;;  %v2246_v15 = vld [vmem:[#allocation2 + $0xa8] ss:$0 sm:$0xff]  ;;  %v40_v28 = vld [vmem:[%s2630_s0 + $0x18] sm:$0xff]  ;;  %v41_v29 = vld [vmem:[%s2630_s0 + $0x20] sm:$0xff]  ;;  %vm1226_vm7 = vcmask 1045509   ;;  %vm1228_vm8 = vcmask 1046534  }
  0x13   :  { %1890 = vmatmul.mubr.msk.f32.vlgmr.msra.gmra.mxu0 %vm47_vm1, %v38_v5  ;;  %1902 = vmatprep.subr.mxu1 %v2150_v0  ;;  %v42_v30 = vld [vmem:[%s2630_s0 + $0x28] sm:$0xff]  ;;  %vm1230_vm9 = vcmask 1047559   ;;  %vm1716_vm10 = vcmask 39936  }
  0x14   :  { %1903 = vmatpush3.msra.mxu1 %v2206_v6  ;;  %253 = vrot.lane.b32.xlu0 %v1794_v7, %s2152_s30 }
  0x15   :  { %1904 = vmatprep.subr.mxu1 %v2150_v0  ;;  %1909 = vmatprep.subr.mxu0 %v2150_v0 }
  0x16   :  { %1905 = vmatpush3.msra.mxu1 %v2212_v8  ;;  %1910 = vmatpush3.msra.mxu0 %v2194_v1 }
  0x17   :  { %1907 = vmatmul.mubr.msk.f32.vlgmr.msra.gmra.mxu1 %vm167_vm2, %v166_v9  ;;  %1911 = vmatprep.subr.mxu0 %v2150_v0 }
  0x18   :  { %1912 = vmatpush3.msra.mxu0 %v2200_v4  ;;  %1920 = vmatprep.subr.mxu1 %v2150_v0 }
  0x19   :  { %1913 = vmatprep.subr.mxu0 %v2150_v0  ;;  %1921 = vmatpush3.msra.mxu1 %v2194_v1 }
  0x1a   :  { %1914 = vmatpush3.msra.mxu0 %v2206_v6  ;;  %1922 = vmatprep.subr.mxu1 %v2150_v0 }
  0x1b   :  { %1915 = vmatprep.subr.mxu0 %v2150_v0  ;;  %1923 = vmatpush3.msra.mxu1 %v2200_v4 }
  0x1c   :  { %1916 = vmatpush3.msra.mxu0 %v2212_v8  ;;  %1924 = vmatprep.subr.mxu1 %v2150_v0 }
  0x1d   :  { %1925 = vmatpush3.msra.mxu1 %v2206_v6  ;;  %1928 = vmatprep.mubr.msk.f32.mxu1 %vm2151_vm0, %v2150_v0 }
  0x1e   :  { %1926 = vmatprep.subr.mxu1 %v2150_v0  ;;  %1931 = vmatprep.subr.mxu0 %v2150_v0 }
  0x1f   :  { %1927 = vmatpush3.msra.mxu1 %v2212_v8  ;;  %1892 = vmatprep.mubr.msk.f32.mxu0 %vm47_vm1, %v39_v27 }
  0x20   :  { %1942 = vmatprep.subr.mxu1 %v2150_v0  ;;  %1893 = vmatmul.mubr.msk.f32.gmra.mxu0 %vm47_vm1, %v40_v28 }
  0x21   :  { %1895 = vmatprep.mubr.msk.f32.mxu0 %vm47_vm1, %v41_v29 }
  0x24   :  { %1896 = vmatmul.mubr.msk.f32.gmra.mxu0 %vm47_vm1, %v42_v30 }
  0x25   :  { %1917 = vmatprep.mubr.msk.f32.mxu0 %vm2151_vm0, %v2150_v0 }
  0x86   :  { %v2242_v10 = vpop.permute.xlu0 %253 }
  0xd3   :  { %v1891_v14 = vpop.f32.mrf.mxu0 }
  0xd4   :  { %v138_v46 = vadd.f32 %v1891_v14, %v2246_v15 }
  0xd5   :  { %v132_v16 = vpop.f32.mrf.mxu0 }
  0xd6   :  { %v133_v17 = vadd.f32 %v2246_v15, %v132_v16 }
  0xd7   :  { %v237_v11 = vpop.f32.mrf.mxu1 }
  0xd8   :  { %v256_v12 = vadd.f32 %v2242_v10, %v237_v11  ;;  %v241_v18 = vadd.f32 %v237_v11, %v133_v17 }
  0xd9   :  { %v1908_v13 = vpop.f32.mrf.mxu1 }
  0xda   :  { %258 = vrot.lane.b32.xlu0 %v256_v12, %s2152_s30  ;;  %v1793_v19 = vmul.f32 -1.442695, %v241_v18 }
  0xdc   :  { %2033 = vpow2.f32 %v1793_v19 }
  0xde   :  { %274 = vrot.lane.b32.xlu0 %v166_v9, %s2153_s1 }
  0xe0   :  { %v2281_v39 = vpop.f32.mrf.mxu0 }
  0xe1   :  { %v148_v28 = vadd.f32 %v2281_v39, %v2246_v15 }
  0xe2   :  { %v142_v40 = vpop.f32.mrf.mxu0 }
  0xe3   :  { %v143_v5 = vadd.f32 %v2246_v15, %v142_v40 }
  0xe4   :  { %v2283_v41 = vpop.f32.mrf.mxu0 }
  0xe6   :  { %v2285_v42 = vpop.f32.mrf.mxu0 }
  0xe9   :  { %v2034_v20 = vpop.eup %2033 }
  0xea   :  { %v245_v21 = vadd.f32 1.0, %v2034_v20 }
  0xec   :  { %2035 = vrcp.f32 %v245_v21 }
  0xf9   :  { %v2036_v22 = vpop.eup %2035 }
  0xfa   :  { %v268_v33 = vsub.f32 1.0, %v2036_v22 }
 0x14c   :  { %v259_v23 = vpop.permute.xlu0 %258 }
 0x14d   :  { %v261_v24 = vmul.f32 %v2036_v22, %v259_v23 }
 0x14f   :  { %263 = vrot.lane.b32.xlu1 %v261_v24, %s2152_s30 }
 0x150   :  { %v275_v32 = vpop.permute.xlu0 %274 }
 0x151   :  { %v277_v35 = vmul.f32 %v2036_v22, %v275_v32 }
 0x1c1   :  { %v264_v25 = vpop.permute.xlu1 %263 }
 0x1c2   :  { %v266_v26 = vadd.f32 %v264_v25, %v133_v17 }
 0x1c4   :  { %2037 = vtanh.f32 %v266_v26 }
 0x1d1   :  { %v2038_v31 = vpop.eup %2037 }
 0x1d2   :  { %270 = vrot.lane.b32.xlu1 %v2038_v31, %s2154_s14 }
 0x244   :  { %v271_v34 = vpop.permute.xlu1 %270 }
 0x245   :  { %v273_v36 = vmul.f32 %v271_v34, %v268_v33 }
 0x247   :  { %v278_v37 = vadd.f32 %v277_v35, %v273_v36 }
 0x249   :  { %280 = vrot.lane.b32.xlu1 %v278_v37, %s2154_s14 }
 0x2bb   :  { %v281_v38 = vpop.permute.xlu1 %280 }
 0x2bc   :  { %1918 = vmatmul.mubr.msk.f32.vlgmr.msra.gmra.mxu0 %vm167_vm2, %v281_v38 }
 0x2bd   :  { %1932 = vmatpush3.msra.mxu0 %v2194_v1  ;;  %1939 = vmatprep.mubr.msk.f32.mxu0 %vm2151_vm0, %v2150_v0 }
 0x2be   :  { %1933 = vmatprep.subr.mxu0 %v2150_v0 }
 0x2bf   :  { %1934 = vmatpush3.msra.mxu0 %v2200_v4 }
 0x2c0   :  { %1935 = vmatprep.subr.mxu0 %v2150_v0 }
 0x2c1   :  { %1936 = vmatpush3.msra.mxu0 %v2206_v6 }
 0x2c2   :  { %1937 = vmatprep.subr.mxu0 %v2150_v0 }
 0x2c3   :  { %1938 = vmatpush3.msra.mxu0 %v2212_v8 }
 0x2c4   :  { %1953 = vmatprep.subr.mxu0 %v2150_v0 }
 0x37c   :  { %v350_v43 = vpop.f32.mrf.mxu0 }
 0x37d   :  { %v361_v44 = vadd.f32 %v350_v43, %v2242_v10  ;;  %v354_v47 = vadd.f32 %v350_v43, %v138_v46 }
 0x37e   :  { %v1919_v45 = vpop.f32.mrf.mxu0 }
 0x37f   :  { %363 = vrot.lane.b32.xlu0 %v361_v44, %s2152_s30  ;;  %v1796_v48 = vmul.f32 -1.442695, %v354_v47  ;;  %v153_v47 = vadd.f32 %v2246_v15, %v2285_v42 }
 0x381   :  { %2039 = vpow2.f32 %v1796_v48 }
 0x38e   :  { %v2040_v49 = vpop.eup %2039 }
 0x38f   :  { %v358_v50 = vadd.f32 1.0, %v2040_v49 }
 0x391   :  { %2041 = vrcp.f32 %v358_v50 }
 0x39e   :  { %v2042_v51 = vpop.eup %2041 }
 0x39f   :  { %v373_v57 = vsub.f32 1.0, %v2042_v51  ;;  %v379_v59 = vmul.f32 %v2042_v51, %v278_v37 }
 0x3f1   :  { %v364_v52 = vpop.permute.xlu0 %363 }
 0x3f2   :  { %v366_v53 = vmul.f32 %v2042_v51, %v364_v52 }
 0x3f4   :  { %368 = vrot.lane.b32.xlu1 %v366_v53, %s2152_s30 }
 0x466   :  { %v369_v54 = vpop.permute.xlu1 %368 }
 0x467   :  { %v371_v55 = vadd.f32 %v369_v54, %v138_v46 }
 0x469   :  { %2043 = vtanh.f32 %v371_v55 }
 0x476   :  { %v2044_v56 = vpop.eup %2043 }
 0x477   :  { %375 = vrot.lane.b32.xlu0 %v2044_v56, %s2154_s14 }
 0x4e9   :  { %v376_v58 = vpop.permute.xlu0 %375 }
 0x4ea   :  { %v378_v60 = vmul.f32 %v376_v58, %v373_v57 }
 0x4ec   :  { %v380_v61 = vadd.f32 %v379_v59, %v378_v60 }
 0x4ee   :  { %382 = vrot.lane.b32.xlu1 %v380_v61, %s2154_s14 }
 0x560   :  { %v383_v62 = vpop.permute.xlu1 %382 }
 0x561   :  { %1929 = vmatmul.mubr.msk.f32.vlgmr.msra.gmra.mxu1 %vm167_vm2, %v383_v62 }
 0x562   :  { %1943 = vmatpush3.msra.mxu1 %v2194_v1  ;;  %1950 = vmatprep.mubr.msk.f32.mxu1 %vm2151_vm0, %v2150_v0 }
 0x563   :  { %1944 = vmatprep.subr.mxu1 %v2150_v0 }
 0x564   :  { %1945 = vmatpush3.msra.mxu1 %v2200_v4 }
 0x565   :  { %1946 = vmatprep.subr.mxu1 %v2150_v0 }
 0x566   :  { %1947 = vmatpush3.msra.mxu1 %v2206_v6 }
 0x567   :  { %1948 = vmatprep.subr.mxu1 %v2150_v0 }
 0x568   :  { %1949 = vmatpush3.msra.mxu1 %v2212_v8 }
 0x621   :  { %v452_v63 = vpop.f32.mrf.mxu1 }
 0x622   :  { %v463_v2 = vadd.f32 %v452_v63, %v2242_v10  ;;  %v456_v7 = vadd.f32 %v452_v63, %v143_v5 }
 0x623   :  { %v1930_v3 = vpop.f32.mrf.mxu1 }
 0x624   :  { %465 = vrot.lane.b32.xlu0 %v463_v2, %s2152_s30  ;;  %v1798_v9 = vmul.f32 -1.442695, %v456_v7 }
 0x626   :  { %2045 = vpow2.f32 %v1798_v9 }
 0x633   :  { %v2046_v11 = vpop.eup %2045 }
 0x634   :  { %v460_v12 = vadd.f32 1.0, %v2046_v11 }
 0x636   :  { %2047 = vrcp.f32 %v460_v12 }
 0x643   :  { %v2048_v13 = vpop.eup %2047 }
 0x644   :  { %v475_v20 = vsub.f32 1.0, %v2048_v13  ;;  %v481_v22 = vmul.f32 %v2048_v13, %v380_v61 }
 0x696   :  { %v466_v14 = vpop.permute.xlu0 %465 }
 0x697   :  { %v468_v16 = vmul.f32 %v2048_v13, %v466_v14 }
 0x699   :  { %470 = vrot.lane.b32.xlu1 %v468_v16, %s2152_s30 }
 0x70b   :  { %v471_v17 = vpop.permute.xlu1 %470 }
 0x70c   :  { %v473_v18 = vadd.f32 %v471_v17, %v143_v5  ;;  %v158_v5 = vadd.f32 %v2283_v41, %v2246_v15  ;;  %v963_v15 = vld [vmem:[#allocation2 + $0x30] sm:$0xff]  ;;  %v962_v41 = vld [vmem:[#allocation2 + $0x28] sm:$0xff] }
 0x70e   :  { %2049 = vtanh.f32 %v473_v18 }
 0x71b   :  { %v2050_v19 = vpop.eup %2049 }
 0x71c   :  { %477 = vrot.lane.b32.xlu0 %v2050_v19, %s2154_s14  ;;  %v964_v19 = vld [vmem:[#allocation2 + $0x38] sm:$0xff] }
 0x78e   :  { %v478_v21 = vpop.permute.xlu0 %477 }
 0x78f   :  { %v480_v23 = vmul.f32 %v478_v21, %v475_v20 }
 0x791   :  { %v482_v24 = vadd.f32 %v481_v22, %v480_v23 }
 0x793   :  { %484 = vrot.lane.b32.xlu1 %v482_v24, %s2154_s14 }
 0x805   :  { %v485_v25 = vpop.permute.xlu1 %484 }
 0x806   :  { %1940 = vmatmul.mubr.msk.f32.vlgmr.msra.gmra.mxu0 %vm167_vm2, %v485_v25 }
 0x807   :  { %1954 = vmatpush3.msra.mxu0 %v2194_v1  ;;  %1961 = vmatprep.mubr.msk.f32.mxu0 %vm2151_vm0, %v2150_v0 }
 0x808   :  { %1955 = vmatprep.subr.mxu0 %v2150_v0 }
 0x809   :  { %1956 = vmatpush3.msra.mxu0 %v2200_v4 }
 0x80a   :  { %1957 = vmatprep.subr.mxu0 %v2150_v0 }
 0x80b   :  { %1958 = vmatpush3.msra.mxu0 %v2206_v6 }
 0x80c   :  { %1959 = vmatprep.subr.mxu0 %v2150_v0 }
 0x80d   :  { %1960 = vmatpush3.msra.mxu0 %v2212_v8 }
 0x80e   :  { %1987 = vmatprep.subr.mxu0 %v2150_v0 }
 0x8c6   :  { %v554_v26 = vpop.f32.mrf.mxu0 }
 0x8c7   :  { %v565_v1 = vadd.f32 %v554_v26, %v2242_v10  ;;  %v558_v4 = vadd.f32 %v554_v26, %v148_v28 }
 0x8c8   :  { %v1941_v27 = vpop.f32.mrf.mxu0 }
 0x8c9   :  { %567 = vrot.lane.b32.xlu0 %v565_v1, %s2152_s30  ;;  %v1800_v29 = vmul.f32 -1.442695, %v558_v4  ;;  %v2155_v27 = vmov 1966171168   ;;  %v1059_v4 = vlaneseq }
 0x8cb   :  { %2051 = vpow2.f32 %v1800_v29 }
 0x8d8   :  { %v2052_v30 = vpop.eup %2051 }
 0x8d9   :  { %v562_v6 = vadd.f32 1.0, %v2052_v30  ;;  %v2353_v30 = vshrl.u32 %v1059_v4, 7 }
 0x8db   :  { %2053 = vrcp.f32 %v562_v6  ;;  %v1816_v6 = vld [vmem:[#allocation2 + $0xaa] ss:$0 sm:$0xff] }
 0x8e8   :  { %v2054_v31 = vpop.eup %2053 }
 0x8e9   :  { %v577_v36 = vsub.f32 1.0, %v2054_v31  ;;  %v583_v38 = vmul.f32 %v2054_v31, %v482_v24 }
 0x93b   :  { %v568_v32 = vpop.permute.xlu0 %567 }
 0x93c   :  { %v570_v8 = vmul.f32 %v2054_v31, %v568_v32 }
 0x93e   :  { %572 = vrot.lane.b32.xlu1 %v570_v8, %s2152_s30 }
 0x9b0   :  { %v573_v33 = vpop.permute.xlu1 %572 }
 0x9b1   :  { %v575_v34 = vadd.f32 %v573_v33, %v148_v28  ;;  %v1057_v28 = vunpack.c.l.s4 %v2155_v27 }
 0x9b3   :  { %2055 = vtanh.f32 %v575_v34  ;;  %v1058_v29 = vunpack.c.0.s8 %v1057_v28 }
 0x9b5   :  { %v1061_v31 = vsub.s32 %v1058_v29, %v2353_v30 }
 0x9c0   :  { %v2056_v35 = vpop.eup %2055 }
 0x9c1   :  { %579 = vrot.lane.b32.xlu0 %v2056_v35, %s2154_s14 }
 0xa33   :  { %v580_v37 = vpop.permute.xlu0 %579 }
 0xa34   :  { %v582_v39 = vmul.f32 %v580_v37, %v577_v36  ;;  %v2362_v36 = vsub.s32 0, %v2353_v30 }
 0xa36   :  { %v584_v40 = vadd.f32 %v583_v38, %v582_v39 }
 0xa38   :  { %586 = vrot.lane.b32.xlu1 %v584_v40, %s2154_s14 }
 0xaaa   :  { %v587_v43 = vpop.permute.xlu1 %586 }
 0xaab   :  { %1951 = vmatmul.mubr.msk.f32.vlgmr.msra.gmra.mxu1 %vm167_vm2, %v587_v43 }
 0xb6b   :  { %v656_v44 = vpop.f32.mrf.mxu1 }
 0xb6c   :  { %v667_v45 = vadd.f32 %v656_v44, %v2242_v10  ;;  %v660_v48 = vadd.f32 %v656_v44, %v153_v47 }
 0xb6d   :  { %v1952_v46 = vpop.f32.mrf.mxu1 }
 0xb6e   :  { %669 = vrot.lane.b32.xlu0 %v667_v45, %s2152_s30  ;;  %v1802_v49 = vmul.f32 -1.442695, %v660_v48  ;;  %v2378_v48 = vld [vmem:[%s2632_s2 + $0x10] sm:$0xff] }
 0xb70   :  { %2057 = vpow2.f32 %v1802_v49 }
 0xb7d   :  { %v2058_v50 = vpop.eup %2057 }
 0xb7e   :  { %v664_v51 = vadd.f32 1.0, %v2058_v50 }
 0xb80   :  { %2059 = vrcp.f32 %v664_v51 }
 0xb8d   :  { %v2060_v52 = vpop.eup %2059 }
 0xb8e   :  { %v679_v58 = vsub.f32 1.0, %v2060_v52  ;;  %v685_v42 = vmul.f32 %v2060_v52, %v584_v40  ;;  %v2367_v40 = vld [vmem:[%s2632_s2] sm:$0xff] }
 0xbe0   :  { %v670_v53 = vpop.permute.xlu0 %669 }
 0xbe1   :  { %v672_v54 = vmul.f32 %v2060_v52, %v670_v53 }
 0xbe3   :  { %674 = vrot.lane.b32.xlu1 %v672_v54, %s2152_s30  ;;  %v2387_v54 = vld [vmem:[%s2632_s2 + $0x20] sm:$0xff] }
 0xc55   :  { %v675_v55 = vpop.permute.xlu1 %674 }
 0xc56   :  { %v677_v56 = vadd.f32 %v675_v55, %v153_v47  ;;  %v2373_v47 = vld [vmem:[%s2632_s2 + $0x8] sm:$0xff] }
 0xc58   :  { %2061 = vtanh.f32 %v677_v56 }
 0xc65   :  { %v2062_v57 = vpop.eup %2061 }
 0xc66   :  { %681 = vrot.lane.b32.xlu0 %v2062_v57, %s2154_s14 }
 0xcd8   :  { %v682_v59 = vpop.permute.xlu0 %681 }
 0xcd9   :  { %v684_v60 = vmul.f32 %v682_v59, %v679_v58 }
 0xcdb   :  { %v686_v61 = vadd.f32 %v685_v42, %v684_v60  ;;  %v2395_v60 = vld [vmem:[%s2632_s2 + $0x18] sm:$0xff] }
 0xcdd   :  { %688 = vrot.lane.b32.xlu1 %v686_v61, %s2154_s14 }
 0xd4f   :  { %v689_v62 = vpop.permute.xlu1 %688 }
 0xd50   :  { %1962 = vmatmul.mubr.msk.f32.vlgmr.msra.gmra.mxu0 %vm167_vm2, %v689_v62 }
 0xd51   :  { %1995 = vmatprep.mubr.msk.f32.mxu0 %vm2151_vm0, %v2150_v0 }
 0xe10   :  { %v758_v63 = vpop.f32.mrf.mxu0 }
 0xe11   :  { %v769_v2 = vadd.f32 %v758_v63, %v2242_v10  ;;  %v762_v7 = vadd.f32 %v758_v63, %v158_v5  ;;  %v965_v10 = vld [vmem:[#allocation2 + $0x40] sm:$0xff] }
 0xe12   :  { %v1963_v3 = vpop.f32.mrf.mxu0  ;;  %1988 = vmatpush3.msra.mxu0 %v965_v10  ;;  %v2422_v10 = vld [vmem:[%s2632_s2 + $0x38] sm:$0xff] }
 0xe13   :  { %771 = vrot.lane.b32.xlu0 %v769_v2, %s2152_s30  ;;  %v1804_v9 = vmul.f32 -1.442695, %v762_v7  ;;  %1989 = vmatprep.subr.mxu0 %v2150_v0  ;;  %v2404_v3 = vld [vmem:[%s2632_s2 + $0x30] sm:$0xff] }
 0xe14   :  { %1990 = vmatpush3.msra.mxu0 %v964_v19 }
 0xe15   :  { %2063 = vpow2.f32 %v1804_v9  ;;  %1991 = vmatprep.subr.mxu0 %v2150_v0 }
 0xe16   :  { %1992 = vmatpush3.msra.mxu0 %v963_v15 }
 0xe17   :  { %1993 = vmatprep.subr.mxu0 %v2150_v0 }
 0xe18   :  { %1994 = vmatpush3.msra.mxu0 %v962_v41 }
 0xe19   :  { %1998 = vmatprep.subr.mxu0 %v2150_v0 }
 0xe22   :  { %v2064_v11 = vpop.eup %2063 }
 0xe23   :  { %v766_v12 = vadd.f32 1.0, %v2064_v11 }
 0xe25   :  { %2065 = vrcp.f32 %v766_v12  ;;  %v2412_v12 = vld [vmem:[%s2632_s2 + $0x28] sm:$0xff] }
 0xe32   :  { %v2066_v13 = vpop.eup %2065 }
 0xe33   :  { %v781_v21 = vsub.f32 1.0, %v2066_v13  ;;  %v787_v23 = vmul.f32 %v2066_v13, %v686_v61 }
 0xe85   :  { %v772_v14 = vpop.permute.xlu0 %771 }
 0xe86   :  { %v774_v16 = vmul.f32 %v2066_v13, %v772_v14 }
 0xe88   :  { %776 = vrot.lane.b32.xlu1 %v774_v16, %s2152_s30 }
 0xefa   :  { %v777_v17 = vpop.permute.xlu1 %776 }
 0xefb   :  { %v779_v18 = vadd.f32 %v777_v17, %v158_v5 }
 0xefd   :  { %2067 = vtanh.f32 %v779_v18 }
 0xf0a   :  { %v2068_v20 = vpop.eup %2067 }
 0xf0b   :  { %783 = vrot.lane.b32.xlu0 %v2068_v20, %s2154_s14 }
 0xf7d   :  { %v784_v22 = vpop.permute.xlu0 %783 }
 0xf7e   :  { %v786_v24 = vmul.f32 %v784_v22, %v781_v21  ;;  %v1185_v21 = vand.u32 127, %v1059_v4 }
 0xf80   :  { %v788_v25 = vadd.f32 %v787_v23, %v786_v24  ;;  %v2429_v23 = vsub.s32 %v1185_v21, %v2353_v30 }
 0xf82   :  { %972 = vrot.lane.b32.xlu1 %v788_v25, %s2154_s14 }
 0xff4   :  { %v973_v26 = vpop.permute.xlu1 %972 }
 0xff5   :  { %v1720_v1 = vsel %vm167_vm2, %v973_v26, 0.0  ;;  %1996 = vmatmul.mubr.msk.f32.vlgmr.msra.gmra.mxu0 %vm167_vm2, %v973_v26 }
 0xff6   :  { %1766 = vst [vmem:[#allocation5 + $0x10] sm:$0xff] %v1720_v1  ;;  %2006 = vmatprep.mubr.msk.f32.mxu0 %vm2151_vm0, %v2150_v0 }
0x10b5   :  { %v1042_v32 = vpop.f32.mrf.mxu0 }
0x10b6   :  { %v2356_v8 = vadd.f32 %v1816_v6, %v1042_v32 }
0x10b7   :  { %v1997_v33 = vpop.f32.mrf.mxu0 }
0x10b8   :  { %v1055_v34 = vcombine.high %v2356_v8, %v2356_v8  ;;  %v1062_v35 = vrot.slane %v2356_v8, %v1061_v31 }
0x10ba   :  { %v1069_v37 = vrot.slane %v1055_v34, %v1061_v31  ;;  %v1070_v38 = vcombine.high %v1062_v35, %v1062_v35  ;;  %v1078_v39 = vrot.slane %v1062_v35, %v1061_v31 }
0x10bc   :  { %v1107_v43 = vrot.slane %v1078_v39, %v2362_v36  ;;  %v1092_v44 = vrot.slane %v1070_v38, %v1061_v31  ;;  %v1100_v45 = vcombine.high %v1078_v39, %v1078_v39  ;;  %v1085_v46 = vrot.slane %v1069_v37, %v1061_v31 }
0x10bd   :  { %v1071_v49 = vcombine.high %v1069_v37, %v1069_v37 }
0x10be   :  { %v1144_v50 = vmul.f32 %v1107_v43, %v2367_v40  ;;  %v1111_v51 = vrot.slane %v1092_v44, %v2362_v36  ;;  %v1115_v52 = vrot.slane %v1100_v45, %v2362_v36  ;;  %v1123_v53 = vrot.slane %v1085_v46, %v2362_v36 }
0x10bf   :  { %v1102_v55 = vcombine.high %v1092_v44, %v1092_v44  ;;  %v1101_v56 = vcombine.high %v1085_v46, %v1085_v46  ;;  %v1099_v42 = vrot.slane %v1071_v49, %v1061_v31 }
0x10c0   :  { %v1152_v57 = vsel %vm167_vm2, %v1144_v50, 0.0  ;;  %v1145_v58 = vmul.f32 %v1111_v51, %v2373_v47  ;;  %v1146_v59 = vmul.f32 %v1115_v52, %v2378_v48  ;;  %v1148_v63 = vmul.f32 %v1123_v53, %v2387_v54 }
0x10c1   :  { %1153 = vadd.xlane.f32.xlu0 %v1152_v57  ;;  %v1119_v61 = vrot.slane %v1102_v55, %v2362_v36  ;;  %v1131_v2 = vrot.slane %v1101_v56, %v2362_v36  ;;  %v1127_v9 = vrot.slane %v1099_v42, %v2362_v36  ;;  %v1103_v11 = vcombine.high %v1099_v42, %v1099_v42 }
0x10c2   :  { %v1155_v62 = vsel %vm167_vm2, %v1145_v58, 0.0  ;;  %v1158_v5 = vsel %vm167_vm2, %v1146_v59, 0.0  ;;  %v1164_v13 = vsel %vm167_vm2, %v1148_v63, 0.0  ;;  %v2156_v51 = vmov 0  }
0x10c3   :  { %1156 = vadd.xlane.f32.xlu1 %v1155_v62  ;;  %v1147_v7 = vmul.f32 %v1119_v61, %v2395_v60  ;;  %v1150_v14 = vmul.f32 %v1131_v2, %v2404_v3  ;;  %v1149_v17 = vmul.f32 %v1127_v9, %v2412_v12  ;;  %v1135_v18 = vrot.slane %v1103_v11, %v2362_v36 }
0x10c4   :  { %2032 = vset.pattern.permute.xlu1 %v2156_v51  ;;  %2031 = vset.pattern.permute.xlu0 %v2156_v51  ;;  %v1243_v52 = vsub.s32 1, %v2353_v30  ;;  %v1247_v53 = vsub.s32 2, %v2353_v30  ;;  %v1251_v55 = vsub.s32 3, %v2353_v30  ;;  %v1255_v62 = vsub.s32 4, %v2353_v30 }
0x10c5   :  { %1159 = vadd.xlane.f32.xlu0 %v1158_v5  ;;  %v1161_v16 = vsel %vm167_vm2, %v1147_v7, 0.0  ;;  %v1170_v19 = vsel %vm167_vm2, %v1150_v14, 0.0  ;;  %v1167_v15 = vsel %vm167_vm2, %v1149_v17, 0.0  ;;  %v1151_v41 = vmul.f32 %v1135_v18, %v2422_v10 }
0x10c6   :  { %v1259_v9 = vsub.s32 5, %v2353_v30 }
0x10c7   :  { %1165 = vadd.xlane.f32.xlu1 %v1164_v13  ;;  %v1173_v20 = vsel %vm167_vm2, %v1151_v41, 0.0 }
0x10c9   :  { %1162 = vadd.xlane.f32.xlu0 %v1161_v16  ;;  %v1263_v16 = vsub.s32 6, %v2353_v30 }
0x10cb   :  { %1171 = vadd.xlane.f32.xlu1 %v1170_v19 }
0x10cd   :  { %1168 = vadd.xlane.f32.xlu0 %v1167_v15  ;;  %v1267_v15 = vsub.s32 7, %v2353_v30 }
0x10d1   :  { %1174 = vadd.xlane.f32.xlu0 %v1173_v20 }
0x114a   :  { %v1154_v22 = vpop.xlane.xlu0 %1153 }
0x114b   :  { %v1189_v1 = vrot.slane %v1154_v22, %v2429_v23 }
0x114c   :  { %v1157_v24 = vpop.xlane.xlu1 %1156 }
0x114d   :  { %v1193_v25 = vrot.slane %v1157_v24, %v2429_v23 }
0x114e   :  { %v1160_v26 = vpop.xlane.xlu0 %1159 }
0x114f   :  { %v1197_v27 = vrot.slane %v1160_v26, %v2429_v23  ;;  %v1219_v28 = vsel %vm1218_vm3, %v1193_v25, %v1189_v1 }
0x1150   :  { %v1166_v29 = vpop.xlane.xlu1 %1165 }
0x1151   :  { %v1221_v31 = vsel %vm1220_vm4, %v1197_v27, %v1219_v28  ;;  %v1205_v33 = vrot.slane %v1166_v29, %v2429_v23 }
0x1152   :  { %v1163_v6 = vpop.xlane.xlu0 %1162 }
0x1153   :  { %v1201_v4 = vrot.slane %v1163_v6, %v2429_v23 }
0x1154   :  { %v1172_v35 = vpop.xlane.xlu1 %1171 }
0x1155   :  { %v1223_v32 = vsel %vm1222_vm5, %v1201_v4, %v1221_v31  ;;  %v1213_v43 = vrot.slane %v1172_v35, %v2429_v23 }
0x1156   :  { %v1169_v34 = vpop.xlane.xlu0 %1168  ;;  %v1225_v38 = vsel %vm1224_vm6, %v1205_v33, %v1223_v32 }
0x1157   :  { %v1209_v37 = vrot.slane %v1169_v34, %v2429_v23 }
0x1159   :  { %v1227_v39 = vsel %vm1226_vm7, %v1209_v37, %v1225_v38 }
0x115a   :  { %v1175_v44 = vpop.xlane.xlu0 %1174  ;;  %v1229_v46 = vsel %vm1228_vm8, %v1213_v43, %v1227_v39 }
0x115b   :  { %v1217_v45 = vrot.slane %v1175_v44, %v2429_v23 }
0x115d   :  { %v1231_v49 = vsel %vm1230_vm9, %v1217_v45, %v1229_v46 }
0x115e   :  { %v1233_v50 = vsel %vm47_vm1, %v1231_v49, -inf }
0x115f   :  { %1234 = vmax.xlane.f32.xlu1 %v1233_v50 }
0x11e8   :  { %v1235_v56 = vpop.xlane.xlu1 %1234 }
0x11e9   :  { %v1240_v57 = vrot.slane %v1235_v56, %v2362_v36  ;;  %v1244_v58 = vrot.slane %v1235_v56, %v1243_v52  ;;  %v1248_v59 = vrot.slane %v1235_v56, %v1247_v53  ;;  %v1252_v63 = vrot.slane %v1235_v56, %v1251_v55 }
0x11ea   :  { %v1256_v11 = vrot.slane %v1235_v56, %v1255_v62  ;;  %v1260_v17 = vrot.slane %v1235_v56, %v1259_v9  ;;  %v1264_v41 = vrot.slane %v1235_v56, %v1263_v16 }
0x11eb   :  { %v1277_v42 = vsub.f32 %v1154_v22, %v1240_v57  ;;  %v1278_v61 = vsub.f32 %v1157_v24, %v1244_v58  ;;  %v1279_v2 = vsub.f32 %v1160_v26, %v1248_v59  ;;  %v1280_v13 = vsub.f32 %v1163_v6, %v1252_v63 }
0x11ec   :  { %v1281_v18 = vsub.f32 %v1166_v29, %v1256_v11  ;;  %v1282_v20 = vsub.f32 %v1169_v34, %v1260_v17  ;;  %v1268_v24 = vrot.slane %v1235_v56, %v1267_v15  ;;  %v1283_v25 = vsub.f32 %v1172_v35, %v1264_v41 }
0x11ed   :  { %v1285_v5 = vmul.f32 1.442695, %v1277_v42  ;;  %v1287_v7 = vmul.f32 1.442695, %v1278_v61  ;;  %v1289_v14 = vmul.f32 1.442695, %v1279_v2 }
0x11ee   :  { %v1291_v19 = vmul.f32 1.442695, %v1280_v13  ;;  %v1293_v21 = vmul.f32 1.442695, %v1281_v18  ;;  %v1295_v26 = vmul.f32 1.442695, %v1282_v20  ;;  %v1284_v27 = vsub.f32 %v1175_v44, %v1268_v24 }
0x11ef   :  { %2069 = vpow2.f32 %v1285_v5  ;;  %v1297_v28 = vmul.f32 1.442695, %v1283_v25 }
0x11f0   :  { %2071 = vpow2.f32 %v1287_v7  ;;  %v1299_v6 = vmul.f32 1.442695, %v1284_v27 }
0x11f1   :  { %2073 = vpow2.f32 %v1289_v14 }
0x11f2   :  { %2075 = vpow2.f32 %v1291_v19 }
0x11f3   :  { %2077 = vpow2.f32 %v1293_v21 }
0x11f4   :  { %2079 = vpow2.f32 %v1295_v26 }
0x11f5   :  { %2081 = vpow2.f32 %v1297_v28 }
0x11f6   :  { %2083 = vpow2.f32 %v1299_v6 }
0x11fc   :  { %v2467_v22 = vpop.eup %2069 }
0x11fd   :  { %v2471_v1 = vpop.eup %2071  ;;  %1310 = vperm.xlu0 %2031, %v2467_v22  }
0x11fe   :  { %1313 = vperm.xlu1 %2032, %v2471_v1   ;;  %v2475_v29 = vpop.eup %2073 }
0x11ff   :  { %v2478_v4 = vpop.eup %2075 }
0x1200   :  { %v2481_v31 = vpop.eup %2077 }
0x1201   :  { %v2484_v32 = vpop.eup %2079 }
0x1202   :  { %1316 = vperm.xlu1 %2032, %v2475_v29   ;;  %v2487_v33 = vpop.eup %2081 }
0x1203   :  { %v2490_v34 = vpop.eup %2083 }
0x1206   :  { %1319 = vperm.xlu1 %2032, %v2478_v4  }
0x120a   :  { %1322 = vperm.xlu1 %2032, %v2481_v31  }
0x120e   :  { %1325 = vperm.xlu1 %2032, %v2484_v32  }
0x1212   :  { %1328 = vperm.xlu1 %2032, %v2487_v33  }
0x1216   :  { %1331 = vperm.xlu1 %2032, %v2490_v34  }
0x1278   :  { %v1311_v43 = vpop.permute.xlu0 %1310 }
0x1279   :  { %v1314_v35 = vpop.permute.xlu1 %1313  ;;  %v1336_v46 = vrot.slane %v1311_v43, %v2429_v23  ;;  %v798_v43 = vld [vmem:[%s2633_s3 + $0x20] sm:$0xff] }
0x127a   :  { %v1340_v45 = vrot.slane %v1314_v35, %v2429_v23 }
0x127c   :  { %v1365_v57 = vsel %vm1218_vm3, %v1340_v45, %v1336_v46  ;;  %v1538_v45 = vld [vmem:[#allocation2 + $0x50] sm:$0xff]  ;;  %v799_v46 = vld [vmem:[%s2633_s3 + $0x28] sm:$0xff] }
0x127d   :  { %v1317_v37 = vpop.permute.xlu1 %1316 }
0x127e   :  { %v1344_v49 = vrot.slane %v1317_v37, %v2429_v23  ;;  %v792_v37 = vld [vmem:[#allocation2 + $0x80] sm:$0xff] }
0x127f   :  { %1964 = vmatprep.subr.mxu1 %v792_v37 }
0x1280   :  { %v1366_v59 = vsel %vm1220_vm4, %v1344_v49, %v1365_v57  ;;  %1965 = vmatpush3.msra.mxu1 %v792_v37  ;;  %v800_v49 = vld [vmem:[%s2633_s3 + $0x30] sm:$0xff]  ;;  %v803_v57 = vld [vmem:[%s2633_s3 + $0x48] sm:$0xff] }
0x1281   :  { %v1320_v38 = vpop.permute.xlu1 %1319 }
0x1282   :  { %v1348_v50 = vrot.slane %v1320_v38, %v2429_v23  ;;  %v797_v38 = vld [vmem:[%s2633_s3 + $0x18] sm:$0xff] }
0x1284   :  { %v1367_v61 = vsel %vm1222_vm5, %v1348_v50, %v1366_v59  ;;  %v1537_v50 = vld [vmem:[#allocation2 + $0x48] sm:$0xff] }
0x1285   :  { %v1323_v39 = vpop.permute.xlu1 %1322 }
0x1286   :  { %v1352_v51 = vrot.slane %v1323_v39, %v2429_v23  ;;  %v1540_v39 = vld [vmem:[#allocation2 + $0x60] sm:$0xff] }
0x1287   :  { %1999 = vmatpush3.msra.mxu0 %v1540_v39 }
0x1288   :  { %v1368_v63 = vsel %vm1224_vm6, %v1352_v51, %v1367_v61  ;;  %2000 = vmatprep.subr.mxu0 %v2150_v0  ;;  %v801_v51 = vld [vmem:[%s2633_s3 + $0x38] sm:$0xff] }
0x1289   :  { %v1326_v44 = vpop.permute.xlu1 %1325 }
0x128a   :  { %v1356_v58 = vrot.slane %v1326_v44, %v2429_v23  ;;  %v1539_v44 = vld [vmem:[#allocation2 + $0x58] sm:$0xff] }
0x128b   :  { %2001 = vmatpush3.msra.mxu0 %v1539_v44 }
0x128c   :  { %v1369_v5 = vsel %vm1226_vm7, %v1356_v58, %v1368_v63  ;;  %2002 = vmatprep.subr.mxu0 %v2150_v0 }
0x128d   :  { %v1329_v56 = vpop.permute.xlu1 %1328  ;;  %2003 = vmatpush3.msra.mxu0 %v1538_v45 }
0x128e   :  { %v1360_v42 = vrot.slane %v1329_v56, %v2429_v23  ;;  %2004 = vmatprep.subr.mxu0 %v2150_v0  ;;  %v802_v56 = vld [vmem:[%s2633_s3 + $0x40] sm:$0xff] }
0x128f   :  { %2005 = vmatpush3.msra.mxu0 %v1537_v50 }
0x1290   :  { %v1370_v11 = vsel %vm1228_vm8, %v1360_v42, %v1369_v5 }
0x1291   :  { %v1332_v2 = vpop.permute.xlu1 %1331 }
0x1292   :  { %v1364_v7 = vrot.slane %v1332_v2, %v2429_v23 }
0x1294   :  { %v1371_v13 = vsel %vm1230_vm9, %v1364_v7, %v1370_v11 }
0x1295   :  { %v1373_v14 = vsel %vm47_vm1, %v1371_v13, 0.0 }
0x1296   :  { %1374 = vadd.xlane.f32.xlu1 %v1373_v14 }
0x131f   :  { %v1375_v17 = vpop.xlane.xlu1 %1374 }
0x1320   :  { %v1380_v18 = vrot.slane %v1375_v17, %v2362_v36  ;;  %v1384_v19 = vrot.slane %v1375_v17, %v1243_v52  ;;  %v1388_v41 = vrot.slane %v1375_v17, %v1247_v53  ;;  %v1392_v20 = vrot.slane %v1375_v17, %v1251_v55 }
0x1321   :  { %v1396_v21 = vrot.slane %v1375_v17, %v1255_v62  ;;  %v1400_v36 = vrot.slane %v1375_v17, %v1259_v9  ;;  %v1404_v53 = vrot.slane %v1375_v17, %v1263_v16  ;;  %v1408_v62 = vrot.slane %v1375_v17, %v1267_v15 }
0x1322   :  { %2085 = vrcp.f32 %v1380_v18 }
0x1323   :  { %2087 = vrcp.f32 %v1384_v19 }
0x1324   :  { %2089 = vrcp.f32 %v1388_v41 }
0x1325   :  { %2091 = vrcp.f32 %v1392_v20 }
0x1326   :  { %2093 = vrcp.f32 %v1396_v21 }
0x1327   :  { %2095 = vrcp.f32 %v1400_v36 }
0x1328   :  { %2097 = vrcp.f32 %v1404_v53 }
0x1329   :  { %2099 = vrcp.f32 %v1408_v62 }
0x132f   :  { %v2086_v24 = vpop.eup %2085 }
0x1330   :  { %v1418_v52 = vmul.f32 %v2086_v24, %v2467_v22  ;;  %v2088_v25 = vpop.eup %2087 }
0x1331   :  { %v1420_v55 = vmul.f32 %v2088_v25, %v2471_v1  ;;  %v2090_v26 = vpop.eup %2089 }
0x1332   :  { %1435 = vperm.xlu0 %2031, %v1418_v52   ;;  %v1422_v27 = vmul.f32 %v2090_v26, %v2475_v29  ;;  %v2092_v9 = vpop.eup %2091 }
0x1333   :  { %v1424_v22 = vmul.f32 %v2092_v9, %v2478_v4  ;;  %v2094_v28 = vpop.eup %2093  ;;  %v791_v4 = vld [vmem:[#allocation2 + $0x78] sm:$0xff] }
0x1334   :  { %v1426_v16 = vmul.f32 %v2094_v28, %v2481_v31  ;;  %v2096_v6 = vpop.eup %2095  ;;  %1966 = vmatprep.subr.mxu1 %v791_v4  ;;  %v790_v31 = vld [vmem:[#allocation2 + $0x70] sm:$0xff] }
0x1335   :  { %v1428_v1 = vmul.f32 %v2096_v6, %v2484_v32  ;;  %v2098_v35 = vpop.eup %2097  ;;  %1967 = vmatpush3.msra.mxu1 %v791_v4  ;;  %v789_v32 = vld [vmem:[#allocation2 + $0x68] sm:$0xff] }
0x1336   :  { %1440 = vperm.xlu0 %2031, %v1420_v55   ;;  %v1430_v30 = vmul.f32 %v2098_v35, %v2487_v33  ;;  %v2100_v15 = vpop.eup %2099  ;;  %1968 = vmatprep.subr.mxu1 %v790_v31  ;;  %v794_v33 = vld [vmem:[%s2633_s3] sm:$0xff] }
0x1337   :  { %v1432_v29 = vmul.f32 %v2100_v15, %v2490_v34  ;;  %1969 = vmatpush3.msra.mxu1 %v790_v31  ;;  %1972 = vmatprep.mubr.msk.f32.mxu1 %vm167_vm2, %v794_v33  ;;  %v795_v34 = vld [vmem:[%s2633_s3 + $0x8] sm:$0xff] }
0x1338   :  { %1970 = vmatprep.subr.mxu1 %v789_v32 }
0x1339   :  { %1971 = vmatpush3.msra.mxu1 %v789_v32 }
0x133a   :  { %1445 = vperm.xlu0 %2031, %v1422_v27   ;;  %1973 = vmatmul.mubr.msk.f32.vlgmr.msra.gmra.mxu1 %vm167_vm2, %v795_v34 }
0x133b   :  { %2009 = vmatprep.subr.mxu1 %v2150_v0 }
0x133e   :  { %1450 = vperm.xlu0 %2031, %v1424_v22  }
0x1342   :  { %1455 = vperm.xlu0 %2031, %v1426_v16  }
0x1346   :  { %1460 = vperm.xlu0 %2031, %v1428_v1  }
0x134a   :  { %1465 = vperm.xlu0 %2031, %v1430_v30  }
0x134e   :  { %1470 = vperm.xlu0 %2031, %v1432_v29  }
0x1352   :  { %1556 = vrot.lane.b32.xlu0 %v2356_v8, %s2154_s14  ;;  %v796_v8 = vld [vmem:[%s2633_s3 + $0x10] sm:$0xff]  ;;  %s2157_s3 = smov [#allocation5]  }
0x1353   :  { %1975 = vmatprep.mubr.msk.f32.mxu1 %vm167_vm2, %v796_v8  ;;  %s1776_s21 = sshll.u32 %s2157_s3, 4  ;;  %s1777_s21 = int_to_ptr.vmem [resolvable:$true] %s1776_s21 }
0x1354   :  { %1976 = vmatmul.mubr.msk.f32.gmra.mxu1 %vm167_vm2, %v797_v38  ;;  %s2123_s22 = scalar_lea.vmem %s1777_s21, 768  ;;  %p2128_p6 = scmp.lt.s32.totalorder %s1777_s21, %s1777_s21 }
0x1355   :  { %1978 = vmatprep.mubr.msk.f32.mxu1 %vm167_vm2, %v798_v43  ;;  %p2124_p5 = scmp.ne.s32.totalorder %s1777_s21, %s2123_s22  ;;  %p2129_p7 = scmp.lt.s32.totalorder %s2123_s22, %s2123_s22 }
0x1357   :  { %p2130_p8 = por %p2129_p7, %p2128_p6 }
0x1358   :  { %1979 = vmatmul.mubr.msk.f32.gmra.mxu1 %vm167_vm2, %v799_v46 }
0x1359   :  { %1981 = vmatprep.mubr.msk.f32.mxu1 %vm167_vm2, %v800_v49  ;;  %p2131_p9 = pnand %p2130_p8, %p2124_p5 }
0x135c   :  { %1982 = vmatmul.mubr.msk.f32.gmra.mxu1 %vm167_vm2, %v801_v51 }
0x135d   :  { %1984 = vmatprep.mubr.msk.f32.mxu1 %vm167_vm2, %v802_v56 }
0x1360   :  { %1985 = vmatmul.mubr.msk.f32.gmra.mxu1 %vm167_vm2, %v803_v57 }
0x1361   :  { %2017 = vmatprep.mubr.msk.f32.mxu1 %vm2151_vm0, %v2150_v0 }
0x13ad   :  { %v1436_v58 = vpop.permute.xlu0 %1435 }
0x13ae   :  { %v1473_v61 = vmul.f32 %v1436_v58, %v2367_v40  ;;  %v1725_v26 = vrot.slane %v1436_v58, %v2429_v23 }
0x13b0   :  { %v1481_v7 = vsel %vm167_vm2, %v1473_v61, 0.0 }
0x13b1   :  { %v1441_v59 = vpop.permute.xlu0 %1440  ;;  %v1482_v18 = vrot.slane %v1481_v7, 4 }
0x13b2   :  { %v1474_v42 = vmul.f32 %v1441_v59, %v2373_v47  ;;  %v1729_v55 = vrot.slane %v1441_v59, %v2429_v23 }
0x13b4   :  { %v1488_v5 = vsel %vm167_vm2, %v1474_v42, 0.0  ;;  %v1754_v15 = vsel %vm1218_vm3, %v1729_v55, %v1725_v26 }
0x13b5   :  { %v1446_v63 = vpop.permute.xlu0 %1445  ;;  %v1489_v17 = vrot.slane %v1488_v5, 4 }
0x13b6   :  { %v1475_v2 = vmul.f32 %v1446_v63, %v2378_v48  ;;  %v1483_v48 = vadd.f32 %v1482_v18, %v1481_v7  ;;  %v1733_v27 = vrot.slane %v1446_v63, %v2429_v23 }
0x13b7   :  { %v1490_v21 = vadd.f32 %v1489_v17, %v1488_v5 }
0x13b8   :  { %v1495_v11 = vsel %vm167_vm2, %v1475_v2, 0.0  ;;  %v1484_v22 = vrot.slane %v1483_v48, 2  ;;  %v1755_v31 = vsel %vm1220_vm4, %v1733_v27, %v1754_v15 }
0x13b9   :  { %v1451_v13 = vpop.permute.xlu0 %1450  ;;  %v1496_v19 = vrot.slane %v1495_v11, 4  ;;  %v1491_v62 = vrot.slane %v1490_v21, 2 }
0x13ba   :  { %v1476_v14 = vmul.f32 %v1451_v13, %v2395_v60  ;;  %v1737_v28 = vrot.slane %v1451_v13, %v2429_v23  ;;  %v1485_v34 = vadd.f32 %v1484_v22, %v1483_v48 }
0x13bb   :  { %v1497_v24 = vadd.f32 %v1496_v19, %v1495_v11  ;;  %v1492_v4 = vadd.f32 %v1491_v62, %v1490_v21 }
0x13bc   :  { %v1502_v41 = vsel %vm167_vm2, %v1476_v14, 0.0  ;;  %v1756_v38 = vsel %vm1222_vm5, %v1737_v28, %v1755_v31  ;;  %v1486_v61 = vrot.slane %v1485_v34, 1 }
0x13bd   :  { %v1503_v47 = vrot.slane %v1502_v41, 4  ;;  %v1456_v20 = vpop.permute.xlu0 %1455  ;;  %v1493_v57 = vrot.slane %v1492_v4, 1 }
0x13be   :  { %v1477_v40 = vmul.f32 %v1456_v20, %v2387_v54  ;;  %v1498_v54 = vrot.slane %v1497_v24, 2  ;;  %v1741_v1 = vrot.slane %v1456_v20, %v2429_v23 }
0x13bf   :  { %v1504_v52 = vadd.f32 %v1503_v47, %v1502_v41  ;;  %v1487_v47 = vadd.f32 %v1486_v61, %v1485_v34  ;;  %v1636_v61 = vld [vmem:[#allocation2 + $0x98] sm:$0xff] }
0x13c0   :  { %v1509_v36 = vsel %vm167_vm2, %v1477_v40, 0.0  ;;  %v1499_v8 = vadd.f32 %v1498_v54, %v1497_v24  ;;  %v1757_v44 = vsel %vm1224_vm6, %v1741_v1, %v1756_v38  ;;  %v1805_v54 = vld [vmem:[#allocation2 + $0xab] ss:$0 sm:$0xff] }
0x13c1   :  { %v1510_v25 = vrot.slane %v1509_v36, 4  ;;  %v1461_v53 = vpop.permute.xlu0 %1460  ;;  %v1505_v6 = vrot.slane %v1504_v52, 2 }
0x13c2   :  { %v1478_v60 = vmul.f32 %v1461_v53, %v2412_v12  ;;  %v1745_v29 = vrot.slane %v1461_v53, %v2429_v23  ;;  %v1500_v63 = vrot.slane %v1499_v8, 1 }
0x13c3   :  { %v1511_v9 = vadd.f32 %v1510_v25, %v1509_v36  ;;  %v1506_v43 = vadd.f32 %v1505_v6, %v1504_v52 }
0x13c4   :  { %v1516_v16 = vsel %vm167_vm2, %v1478_v60, 0.0  ;;  %v1501_v41 = vadd.f32 %v1500_v63, %v1499_v8  ;;  %v1635_v63 = vld [vmem:[#allocation2 + $0x90] sm:$0xff] }
0x13c5   :  { %v1517_v35 = vrot.slane %v1516_v16, 4  ;;  %v1466_v30 = vpop.permute.xlu0 %1465  ;;  %v1512_v12 = vrot.slane %v1511_v9, 2  ;;  %v1507_v7 = vrot.slane %v1506_v43, 1 }
0x13c6   :  { %v1479_v37 = vmul.f32 %v1466_v30, %v2404_v3  ;;  %v1749_v33 = vrot.slane %v1466_v30, %v2429_v23  ;;  %v1758_v3 = vsel %vm1226_vm7, %v1745_v29, %v1757_v44 }
0x13c7   :  { %v1518_v32 = vadd.f32 %v1517_v35, %v1516_v16  ;;  %v1513_v50 = vadd.f32 %v1512_v12, %v1511_v9  ;;  %v1508_v20 = vadd.f32 %v1507_v7, %v1506_v43 }
0x13c8   :  { %v1523_v39 = vsel %vm167_vm2, %v1479_v37, 0.0  ;;  %v1759_v42 = vsel %vm1228_vm8, %v1749_v33, %v1758_v3 }
0x13c9   :  { %v1519_v45 = vrot.slane %v1518_v32, 2  ;;  %v1524_v46 = vrot.slane %v1523_v39, 4  ;;  %v1471_v49 = vpop.permute.xlu0 %1470  ;;  %v1514_v17 = vrot.slane %v1513_v50, 1 }
0x13ca   :  { %v1480_v51 = vmul.f32 %v1471_v49, %v2422_v10  ;;  %v1753_v56 = vrot.slane %v1471_v49, %v2429_v23  ;;  %v1494_v10 = vadd.f32 %v1493_v57, %v1492_v4 }
0x13cb   :  { %v1520_v58 = vadd.f32 %v1519_v45, %v1518_v32  ;;  %v1525_v59 = vadd.f32 %v1524_v46, %v1523_v39  ;;  %v1515_v48 = vadd.f32 %v1514_v17, %v1513_v50 }
0x13cc   :  { %v1530_v2 = vsel %vm167_vm2, %v1480_v51, 0.0  ;;  %v1760_v5 = vsel %vm1230_vm9, %v1753_v56, %v1759_v42  ;;  %v1549_v24 = vsel %vm1218_vm3, %v1494_v10, %v1487_v47 }
0x13cd   :  { %v1526_v11 = vrot.slane %v1525_v59, 2  ;;  %v1531_v13 = vrot.slane %v1530_v2, 4  ;;  %v1762_v14 = vsel %vm47_vm1, %v1760_v5, 0.0  ;;  %v1521_v23 = vrot.slane %v1520_v58, 1  ;;  %v1557_v5 = vpop.permute.xlu0 %1556 }
0x13ce   :  { %1768 = vst [vmem:[#allocation5 + $0x20] sm:$0xff] %v1762_v14  ;;  %v1550_v25 = vsel %vm1220_vm4, %v1501_v41, %v1549_v24 }
0x13cf   :  { %v1527_v18 = vadd.f32 %v1526_v11, %v1525_v59  ;;  %v1532_v19 = vadd.f32 %v1531_v13, %v1530_v2  ;;  %v1522_v36 = vadd.f32 %v1521_v23, %v1520_v58  ;;  %v1551_v55 = vsel %vm1222_vm5, %v1508_v20, %v1550_v25  ;;  %v1637_v58 = vld [vmem:[#allocation2 + $0xa0] sm:$0xff]  ;;  %v1634_v2 = vld [vmem:[#allocation2 + $0x88] sm:$0xff] }
0x13d0   :  { %v1552_v26 = vsel %vm1224_vm6, %v1515_v48, %v1551_v55  ;;  %2010 = vmatpush3.msra.mxu1 %v1637_v58 }
0x13d1   :  { %v1528_v40 = vrot.slane %v1527_v18, 1  ;;  %v1533_v21 = vrot.slane %v1532_v19, 2  ;;  %v1553_v27 = vsel %vm1226_vm7, %v1522_v36, %v1552_v26  ;;  %2011 = vmatprep.subr.mxu1 %v2150_v0 }
0x13d2   :  { %2012 = vmatpush3.msra.mxu1 %v1636_v61 }
0x13d3   :  { %v1534_v52 = vadd.f32 %v1533_v21, %v1532_v19  ;;  %v1529_v53 = vadd.f32 %v1528_v40, %v1527_v18  ;;  %2013 = vmatprep.subr.mxu1 %v2150_v0  ;;  %v1819_v19 = vld [vmem:[#allocation2 + $0xac] ss:$0 sm:$0xff] }
0x13d4   :  { %2014 = vmatpush3.msra.mxu1 %v1635_v63 }
0x13d5   :  { %v1535_v60 = vrot.slane %v1534_v52, 1  ;;  %v1554_v9 = vsel %vm1228_vm8, %v1529_v53, %v1553_v27  ;;  %2015 = vmatprep.subr.mxu1 %v2150_v0 }
0x13d6   :  { %2016 = vmatpush3.msra.mxu1 %v1634_v2 }
0x13d7   :  { %v1536_v62 = vadd.f32 %v1535_v60, %v1534_v52 }
0x13d9   :  { %v1555_v22 = vsel %vm1230_vm9, %v1536_v62, %v1554_v9 }
0x13da   :  { %2007 = vmatmul.mubr.msk.f32.vlgmr.msra.gmra.mxu0 %vm167_vm2, %v1555_v22 }
0x13fa   :  { %v1974_v28 = vpop.f32.mrf.mxu1 }
0x13fb   :  { %v910_v16 = vadd.f32 %v1974_v28, %v1805_v54 }
0x13fc   :  { %v904_v6 = vpop.f32.mrf.mxu1 }
0x13fd   :  { %v905_v1 = vadd.f32 %v1805_v54, %v904_v6 }
0x13ff   :  { %v953_v30 = vmax.f32 %v905_v1, %v910_v16 }
0x1414   :  { %v1977_v35 = vpop.f32.mrf.mxu1 }
0x1415   :  { %v920_v12 = vadd.f32 %v1977_v35, %v1805_v54 }
0x1416   :  { %v914_v15 = vpop.f32.mrf.mxu1 }
0x1417   :  { %v915_v29 = vadd.f32 %v1805_v54, %v914_v15 }
0x1418   :  { %v1980_v37 = vpop.f32.mrf.mxu1 }
0x1419   :  { %v954_v4 = vmax.f32 %v953_v30, %v915_v29  ;;  %v930_v32 = vadd.f32 %v1980_v37, %v1805_v54 }
0x141a   :  { %v924_v31 = vpop.f32.mrf.mxu1 }
0x141b   :  { %v925_v33 = vadd.f32 %v1805_v54, %v924_v31  ;;  %v955_v34 = vmax.f32 %v954_v4, %v920_v12 }
0x141c   :  { %v1983_v8 = vpop.f32.mrf.mxu1 }
0x141d   :  { %v956_v38 = vmax.f32 %v955_v34, %v925_v33  ;;  %v940_v43 = vadd.f32 %v1983_v8, %v1805_v54 }
0x141e   :  { %v934_v39 = vpop.f32.mrf.mxu1 }
0x141f   :  { %v935_v44 = vadd.f32 %v1805_v54, %v934_v39  ;;  %v957_v45 = vmax.f32 %v956_v38, %v930_v32 }
0x1420   :  { %v1986_v46 = vpop.f32.mrf.mxu1 }
0x1421   :  { %v958_v49 = vmax.f32 %v957_v45, %v935_v44  ;;  %v950_v56 = vadd.f32 %v1986_v46, %v1805_v54 }
0x1422   :  { %v944_v50 = vpop.f32.mrf.mxu1 }
0x1423   :  { %v945_v3 = vadd.f32 %v1805_v54, %v944_v50  ;;  %v959_v51 = vmax.f32 %v958_v49, %v940_v43 }
0x1425   :  { %v960_v57 = vmax.f32 %v959_v51, %v945_v3 }
0x1427   :  { %v961_v59 = vmax.f32 %v960_v57, %v950_v56 }
0x1429   :  { %v1718_v42 = vsel %vm167_vm2, %v961_v59, 0.0 }
0x142a   :  { %1765 = vst [vmem:[#allocation5 + $0x8] sm:$0xff] %v1718_v42 }
0x149a   :  { %v1627_v7 = vpop.f32.mrf.mxu0 }
0x149b   :  { %v1628_v11 = vadd.f32 %v1627_v7, %v1557_v5 }
0x149c   :  { %v2008_v13 = vpop.f32.mrf.mxu0 }
0x149d   :  { %2101 = vtanh.f32 %v1628_v11 }
0x14aa   :  { %v2102_v14 = vpop.eup %2101 }
0x14ab   :  { %v1721_v17 = vsel %vm167_vm2, %v2102_v14, 0.0  ;;  %v1632_v10 = vadd.f32 %v2102_v14, %v961_v59 }
0x14ac   :  { %1767 = vst [vmem:[#allocation5 + $0x18] sm:$0xff] %v1721_v17 }
0x14ad   :  { %v1633_v23 = vmul.f32 0.5, %v1632_v10 }
0x14af   :  { %v1763_v18 = vsel %vm167_vm2, %v1633_v23, 0.0  ;;  %2018 = vmatmul.mubr.msk.f32.vlgmr.msra.gmra.mxu1 %vm167_vm2, %v1633_v23 }
0x14b0   :  { %1769 = vst [vmem:[#allocation5 + $0x28] sm:$0xff] %v1763_v18 }
0x156f   :  { %v1712_v0 = vpop.f32.mrf.mxu1 }
0x1570   :  { %v1713_v41 = vadd.f32 %v1819_v19, %v1712_v0 }
0x1571   :  { %v2019_v47 = vpop.f32.mrf.mxu1 }
0x1572   :  { %v1717_v20 = vsel %vm1716_vm10, %v1713_v41, 0.0 }
0x1573   :  { %1764 = vst [vmem:[#allocation5] sm:$0xff] %v1717_v20 }
0x1574   :  { %2134 = shalt.err (!%p2131_p9)
}
0x1575   :  { %1779 = dma.vmem_to_hbm [thread:$0]  %s1777_s21, 768, %s2635_s5, [#allocation4]  }
0x1576   :  { %2145 = dma.done.wait [#allocation4], 768  }
0x1577   :  { %2146 = vsyncadd [#allocation4], 4294966528 }
0x1578   :  { %1783 = vsyncpa [#allocation3], 1 }
0x1579   :  { %1784 = vsyncpa [#allocation4], 1 }

</bundles_post_ra>
